<compile_context>
chip_gen: v7x
topology: tpu7x:2x2x1
jax: 0.10.0
libtpu: 0.0.40
codegen_flags: <defaults>
</compile_context>

<pallas_src>
import functools

import jax
import jax.numpy as jnp
from jax.experimental import pallas as pl
from jax.experimental.pallas import tpu as pltpu

BASE_SIZE = 384 + 512   # 896
HIDDEN = 256
OUT = 512


def _twin_mlp_kernel(x1_ref, x2_ref, w1_ref, b1_ref, w2_ref, b2_ref,
                     o1_ref, o2_ref, *, fuse_branches):
    # x*_ref : (TM, BASE_SIZE)  VMEM (any float dtype)
    # w1_ref : (BASE_SIZE, HIDDEN)   pre-cast to the MXU dtype by the caller
    # b1_ref : (1, HIDDEN)  f32
    # w2_ref : (HIDDEN, OUT)
    # b2_ref : (1, OUT)     f32
    # o*_ref : (TM, OUT)
    w1 = w1_ref[...]
    w2 = w2_ref[...]
    b1 = b1_ref[...]                      # broadcast (1,HIDDEN) over rows, f32
    b2 = b2_ref[...]                      # broadcast (1,OUT) over rows, f32
    mxu_dtype = w1.dtype                  # weight dtype drives MXU precision

    if fuse_branches:
        # Small-tile latency path: one MXU pass per weight matrix for BOTH
        # branches by stacking x1 || x2 along the M dimension.
        tm = x1_ref.shape[0]
        x = jnp.concatenate([x1_ref[...], x2_ref[...]], axis=0).astype(mxu_dtype)
        h = jnp.tanh(jnp.dot(x, w1, preferred_element_type=jnp.float32) + b1)
        # dropout(p=0.2): identity (eval mode)
        y = jnp.tanh(jnp.dot(h.astype(mxu_dtype), w2,
                             preferred_element_type=jnp.float32) + b2)
        o1_ref[...] = y[:tm].astype(o1_ref.dtype)
        o2_ref[...] = y[tm:].astype(o2_ref.dtype)
    else:
        def branch(x_ref, o_ref):
            x = x_ref[...].astype(mxu_dtype)
            h = jnp.dot(x, w1, preferred_element_type=jnp.float32)
            h = jnp.tanh(h + b1)          # bias + tanh in f32 (VPU / EUP)
            # dropout(p=0.2): identity (eval mode)
            y = jnp.dot(h.astype(mxu_dtype), w2,
                        preferred_element_type=jnp.float32)
            o_ref[...] = jnp.tanh(y + b2).astype(o_ref.dtype)

        branch(x1_ref, o1_ref)
        branch(x2_ref, o2_ref)


def _round_up(x, m):
    return ((x + m - 1) // m) * m


@functools.partial(jax.jit, static_argnames=("tile_m", "out_dtype"))
def twin_hybrid_forward(input1, input2, w1, b1, w2, b2, *,
                        tile_m=512, out_dtype=None):
    """Fused twin-MLP forward. input1/input2: (B, BASE_SIZE) -> (B, OUT)."""
    B = input1.shape[0]
    if out_dtype is None:
        out_dtype = input1.dtype

    b1_2d = b1.reshape(1, HIDDEN).astype(jnp.float32)
    b2_2d = b2.reshape(1, OUT).astype(jnp.float32)

    # ---- batch tiling (no padding: Pallas masks the ragged last block) ------
    if B <= tile_m:
        if B > 32:
            # >= 2 grid steps so a dual-TensorCore chip (v7x) can shard the
            # batch across cores; one extra (cheap) step on single-TC chips.
            tm = _round_up(pl.cdiv(B, 2), 8)
        else:
            tm = B        # single block == full dim -> no (8,128) constraint
    else:
        tm = _round_up(tile_m, 8)
    grid_m = pl.cdiv(B, tm)

    # At small M the MXU cost is dominated by streaming the RHS weights
    # through the array; fuse both branches into one matmul pair per step.
    # Only when the tile is 8-aligned (clean sublane concat / split).
    fuse_branches = (tm <= 128) and (tm % 8 == 0)

    # ---- advisory cost model -------------------------------------------------
    in_bytes = input1.dtype.itemsize
    out_bytes = jnp.dtype(out_dtype).itemsize
    w_bytes = w1.dtype.itemsize
    flops = 4 * B * (BASE_SIZE * HIDDEN + HIDDEN * OUT)
    transcendentals = 2 * B * (HIDDEN + OUT)
    bytes_accessed = (2 * B * BASE_SIZE * in_bytes
                      + 2 * B * OUT * out_bytes
                      + (BASE_SIZE * HIDDEN + HIDDEN * OUT) * w_bytes
                      + (HIDDEN + OUT) * 4)

    kernel = functools.partial(_twin_mlp_kernel, fuse_branches=fuse_branches)

    out1, out2 = pl.pallas_call(
        kernel,
        out_shape=(jax.ShapeDtypeStruct((B, OUT), out_dtype),
                   jax.ShapeDtypeStruct((B, OUT), out_dtype)),
        grid_spec=pltpu.PrefetchScalarGridSpec(
            num_scalar_prefetch=0,
            grid=(grid_m,),
            in_specs=[
                pl.BlockSpec((tm, BASE_SIZE), lambda i: (i, 0)),
                pl.BlockSpec((tm, BASE_SIZE), lambda i: (i, 0)),
                pl.BlockSpec((BASE_SIZE, HIDDEN), lambda i: (0, 0)),
                pl.BlockSpec((1, HIDDEN), lambda i: (0, 0)),
                pl.BlockSpec((HIDDEN, OUT), lambda i: (0, 0)),
                pl.BlockSpec((1, OUT), lambda i: (0, 0)),
            ],
            out_specs=[
                pl.BlockSpec((tm, OUT), lambda i: (i, 0)),
                pl.BlockSpec((tm, OUT), lambda i: (i, 0)),
            ],
        ),
        compiler_params=pltpu.CompilerParams(
            dimension_semantics=("parallel",),
            vmem_limit_bytes=48 * 1024 * 1024,
        ),
        cost_estimate=pl.CostEstimate(
            flops=flops,
            transcendentals=transcendentals,
            bytes_accessed=bytes_accessed,
        ),
    )(input1, input2, w1, b1_2d, w2, b2_2d)

    return out1, out2


def prepare_params(w1, b1, w2, b2, *, mxu_dtype=jnp.bfloat16):
    """One-time parameter prep: pre-cast weights to the MXU dtype (bf16 by
    default) so the kernel never re-casts VMEM-resident weights per grid step
    and weight HBM traffic is halved. Biases stay f32."""
    return (jnp.asarray(w1, mxu_dtype), jnp.asarray(b1, jnp.float32),
            jnp.asarray(w2, mxu_dtype), jnp.asarray(b2, jnp.float32))


def init_params(key):
    """Deterministic init matching nn.Linear shapes (pre-transposed to (in,out))."""
    k1, k2, k3, k4 = jax.random.split(key, 4)
    lim1 = 1.0 / jnp.sqrt(BASE_SIZE)
    lim2 = 1.0 / jnp.sqrt(HIDDEN)
    w1 = jax.random.uniform(k1, (BASE_SIZE, HIDDEN), jnp.float32, -lim1, lim1)
    b1 = jax.random.uniform(k2, (HIDDEN,), jnp.float32, -lim1, lim1)
    w2 = jax.random.uniform(k3, (HIDDEN, OUT), jnp.float32, -lim2, lim2)
    b2 = jax.random.uniform(k4, (OUT,), jnp.float32, -lim2, lim2)
    return w1, b1, w2, b2


def reference_forward(input1, input2, w1, b1, w2, b2):
    def branch(x):
        h = jnp.tanh(x @ w1 + b1)
        return jnp.tanh(h @ w2 + b2)
    return branch(input1), branch(input2)


if __name__ == "__main__":
    key = jax.random.PRNGKey(0)
    kp, ka, kb, kc, kd = jax.random.split(key, 5)

    w1_f32, b1, w2_f32, b2 = init_params(kp)
    # One-time parameter prep for the bf16-MXU inference path.
    w1_bf, b1_bf, w2_bf, b2_bf = prepare_params(w1_f32, b1, w2_f32, b2)

    # --- test 1: small batch, bf16-weight MXU path ----------------------------
    B = 4
    input1 = jax.random.normal(ka, (B, BASE_SIZE), jnp.float32)
    input2 = jax.random.normal(kb, (B, BASE_SIZE), jnp.float32)

    x1, x2 = twin_hybrid_forward(input1, input2, w1_bf, b1_bf, w2_bf, b2_bf)
    jax.block_until_ready((x1, x2))
    r1, r2 = reference_forward(input1, input2, w1_f32, b1, w2_f32, b2)
    assert x1.shape == (B, OUT) and x2.shape == (B, OUT)
    assert jnp.allclose(x1, r1, atol=3e-2, rtol=3e-2)
    assert jnp.allclose(x2, r2, atol=3e-2, rtol=3e-2)

    # --- test 2: full-f32 weights (exact path), tight tolerance ---------------
    y1, y2 = twin_hybrid_forward(input1, input2, w1_f32, b1, w2_f32, b2)
    jax.block_until_ready((y1, y2))
    assert jnp.allclose(y1, r1, atol=1e-5, rtol=1e-5)
    assert jnp.allclose(y2, r2, atol=1e-5, rtol=1e-5)

    # --- test 3: ragged batch (B=20, tile_m=8) -> masked last block, fused ----
    B2 = 20
    inp1 = jax.random.normal(kc, (B2, BASE_SIZE), jnp.float32)
    inp2 = jax.random.normal(kd, (B2, BASE_SIZE), jnp.float32)
    z1, z2 = twin_hybrid_forward(inp1, inp2, w1_f32, b1, w2_f32, b2, tile_m=8)
    jax.block_until_ready((z1, z2))
    s1, s2 = reference_forward(inp1, inp2, w1_f32, b1, w2_f32, b2)
    assert z1.shape == (B2, OUT) and z2.shape == (B2, OUT)
    assert jnp.allclose(z1, s1, atol=1e-5, rtol=1e-5)
    assert jnp.allclose(z2, s2, atol=1e-5, rtol=1e-5)

    # --- test 4: B=40 > 32 -> 2-step grid (dual-TC split) + masked tail -------
    B3 = 40
    q1 = jax.random.normal(ka, (B3, BASE_SIZE), jnp.float32)
    q2 = jax.random.normal(kb, (B3, BASE_SIZE), jnp.float32)
    u1, u2 = twin_hybrid_forward(q1, q2, w1_f32, b1, w2_f32, b2)
    jax.block_until_ready((u1, u2))
    t1, t2 = reference_forward(q1, q2, w1_f32, b1, w2_f32, b2)
    assert u1.shape == (B3, OUT) and u2.shape == (B3, OUT)
    assert jnp.allclose(u1, t1, atol=1e-5, rtol=1e-5)
    assert jnp.allclose(u2, t2, atol=1e-5, rtol=1e-5)

    # --- test 5: bf16 I/O path (bf16 inputs, bf16 outputs, bf16 weights) ------
    v1, v2 = twin_hybrid_forward(input1.astype(jnp.bfloat16),
                                 input2.astype(jnp.bfloat16),
                                 w1_bf, b1_bf, w2_bf, b2_bf)
    jax.block_until_ready((v1, v2))
    assert v1.dtype == jnp.bfloat16 and v2.dtype == jnp.bfloat16
    assert jnp.allclose(v1.astype(jnp.float32), r1, atol=5e-2, rtol=5e-2)
    assert jnp.allclose(v2.astype(jnp.float32), r2, atol=5e-2, rtol=5e-2)

    print("KERNEL_OK")
</pallas_src>

<mosaic_0001>
module attributes {stable_mosaic.version = 11 : i64} {
  func.func @_twin_mlp_kernel(%arg0: i32, %arg1: memref<4x896xf32, #tpu.memory_space<vmem>>, %arg2: memref<4x896xf32, #tpu.memory_space<vmem>>, %arg3: memref<896x256xbf16, #tpu.memory_space<vmem>>, %arg4: memref<1x256xf32, #tpu.memory_space<vmem>>, %arg5: memref<256x512xbf16, #tpu.memory_space<vmem>>, %arg6: memref<1x512xf32, #tpu.memory_space<vmem>>, %arg7: memref<4x512xf32, #tpu.memory_space<vmem>>, %arg8: memref<4x512xf32, #tpu.memory_space<vmem>>) attributes {dimension_semantics = [#tpu.dimension_semantics<parallel>], iteration_bounds = array<i64: 1>, scalar_prefetch = 0 : i64, scratch_operands = 0 : i64, tpu.core_type = #tpu.core_type<tc>, window_params = [{transform_indices = @transform_0, window_bounds = array<i64: 4, 896>}, {transform_indices = @transform_1, window_bounds = array<i64: 4, 896>}, {pipeline_mode = #tpu.pipeline_mode<synchronous>, transform_indices = @transform_2, window_bounds = array<i64: 896, 256>}, {pipeline_mode = #tpu.pipeline_mode<synchronous>, transform_indices = @transform_3, window_bounds = array<i64: 1, 256>}, {pipeline_mode = #tpu.pipeline_mode<synchronous>, transform_indices = @transform_4, window_bounds = array<i64: 256, 512>}, {pipeline_mode = #tpu.pipeline_mode<synchronous>, transform_indices = @transform_5, window_bounds = array<i64: 1, 512>}, {transform_indices = @transform_6, window_bounds = array<i64: 4, 512>}, {transform_indices = @transform_7, window_bounds = array<i64: 4, 512>}]} {
    %c0 = arith.constant 0 : index
    %c0_0 = arith.constant 0 : index
    %0 = vector.load %arg3[%c0, %c0_0] : memref<896x256xbf16, #tpu.memory_space<vmem>>, vector<896x256xbf16>
    %c0_1 = arith.constant 0 : index
    %c0_2 = arith.constant 0 : index
    %1 = vector.load %arg5[%c0_1, %c0_2] : memref<256x512xbf16, #tpu.memory_space<vmem>>, vector<256x512xbf16>
    %c0_3 = arith.constant 0 : index
    %c0_4 = arith.constant 0 : index
    %2 = vector.load %arg4[%c0_3, %c0_4] : memref<1x256xf32, #tpu.memory_space<vmem>>, vector<1x256xf32>
    %c0_5 = arith.constant 0 : index
    %c0_6 = arith.constant 0 : index
    %3 = vector.load %arg6[%c0_5, %c0_6] : memref<1x512xf32, #tpu.memory_space<vmem>>, vector<1x512xf32>
    %c0_7 = arith.constant 0 : index
    %c0_8 = arith.constant 0 : index
    %4 = vector.load %arg1[%c0_7, %c0_8] : memref<4x896xf32, #tpu.memory_space<vmem>>, vector<4x896xf32>
    %5 = arith.truncf %4 : vector<4x896xf32> to vector<4x896xbf16>
    %cst = arith.constant dense<0.000000e+00> : vector<4x256xf32>
    %6 = tpu.matmul %5, %0, %cst {dimension_numbers = #tpu.dot_dimension_numbers<[1], [0], [0], [1], [0, 0, 1, 1], [], []>} : vector<4x896xbf16>, vector<896x256xbf16>, vector<4x256xf32> -> vector<4x256xf32>
    %7 = vector.broadcast %2 : vector<1x256xf32> to vector<4x256xf32>
    %8 = arith.addf %6, %7 : vector<4x256xf32>
    %9 = math.tanh %8 : vector<4x256xf32>
    %10 = arith.truncf %9 : vector<4x256xf32> to vector<4x256xbf16>
    %cst_9 = arith.constant dense<0.000000e+00> : vector<4x512xf32>
    %11 = tpu.matmul %10, %1, %cst_9 {dimension_numbers = #tpu.dot_dimension_numbers<[1], [0], [0], [1], [0, 0, 1, 1], [], []>} : vector<4x256xbf16>, vector<256x512xbf16>, vector<4x512xf32> -> vector<4x512xf32>
    %12 = vector.broadcast %3 : vector<1x512xf32> to vector<4x512xf32>
    %13 = arith.addf %11, %12 : vector<4x512xf32>
    %14 = math.tanh %13 : vector<4x512xf32>
    %c0_10 = arith.constant 0 : index
    %c0_11 = arith.constant 0 : index
    %15 = vector.load %arg7[%c0_10, %c0_11] : memref<4x512xf32, #tpu.memory_space<vmem>>, vector<4x512xf32>
    tpu.vector_store %arg7[%c0_10, %c0_11], %14 {strides = array<i32>} : memref<4x512xf32, #tpu.memory_space<vmem>>, vector<4x512xf32>,
    %c0_12 = arith.constant 0 : index
    %c0_13 = arith.constant 0 : index
    %16 = vector.load %arg2[%c0_12, %c0_13] : memref<4x896xf32, #tpu.memory_space<vmem>>, vector<4x896xf32>
    %17 = arith.truncf %16 : vector<4x896xf32> to vector<4x896xbf16>
    %cst_14 = arith.constant dense<0.000000e+00> : vector<4x256xf32>
    %18 = tpu.matmul %17, %0, %cst_14 {dimension_numbers = #tpu.dot_dimension_numbers<[1], [0], [0], [1], [0, 0, 1, 1], [], []>} : vector<4x896xbf16>, vector<896x256xbf16>, vector<4x256xf32> -> vector<4x256xf32>
    %19 = vector.broadcast %2 : vector<1x256xf32> to vector<4x256xf32>
    %20 = arith.addf %18, %19 : vector<4x256xf32>
    %21 = math.tanh %20 : vector<4x256xf32>
    %22 = arith.truncf %21 : vector<4x256xf32> to vector<4x256xbf16>
    %cst_15 = arith.constant dense<0.000000e+00> : vector<4x512xf32>
    %23 = tpu.matmul %22, %1, %cst_15 {dimension_numbers = #tpu.dot_dimension_numbers<[1], [0], [0], [1], [0, 0, 1, 1], [], []>} : vector<4x256xbf16>, vector<256x512xbf16>, vector<4x512xf32> -> vector<4x512xf32>
    %24 = vector.broadcast %3 : vector<1x512xf32> to vector<4x512xf32>
    %25 = arith.addf %23, %24 : vector<4x512xf32>
    %26 = math.tanh %25 : vector<4x512xf32>
    %c0_16 = arith.constant 0 : index
    %c0_17 = arith.constant 0 : index
    %27 = vector.load %arg8[%c0_16, %c0_17] : memref<4x512xf32, #tpu.memory_space<vmem>>, vector<4x512xf32>
    tpu.vector_store %arg8[%c0_16, %c0_17], %26 {strides = array<i32>} : memref<4x512xf32, #tpu.memory_space<vmem>>, vector<4x512xf32>,
    return
  }
  func.func @transform_0(%arg0: i32) -> (i32, i32) {
    %c0_i32 = arith.constant 0 : i32
    %c0_i32_0 = arith.constant 0 : i32
    return %arg0, %c0_i32 : i32, i32
  }
  func.func @transform_1(%arg0: i32) -> (i32, i32) {
    %c0_i32 = arith.constant 0 : i32
    %c0_i32_0 = arith.constant 0 : i32
    return %arg0, %c0_i32 : i32, i32
  }
  func.func @transform_2(%arg0: i32) -> (i32, i32) {
    %c0_i32 = arith.constant 0 : i32
    %c0_i32_0 = arith.constant 0 : i32
    %c0_i32_1 = arith.constant 0 : i32
    return %c0_i32, %c0_i32_0 : i32, i32
  }
  func.func @transform_3(%arg0: i32) -> (i32, i32) {
    %c0_i32 = arith.constant 0 : i32
    %c0_i32_0 = arith.constant 0 : i32
    %c0_i32_1 = arith.constant 0 : i32
    return %c0_i32, %c0_i32_0 : i32, i32
  }
  func.func @transform_4(%arg0: i32) -> (i32, i32) {
    %c0_i32 = arith.constant 0 : i32
    %c0_i32_0 = arith.constant 0 : i32
    %c0_i32_1 = arith.constant 0 : i32
    return %c0_i32, %c0_i32_0 : i32, i32
  }
  func.func @transform_5(%arg0: i32) -> (i32, i32) {
    %c0_i32 = arith.constant 0 : i32
    %c0_i32_0 = arith.constant 0 : i32
    %c0_i32_1 = arith.constant 0 : i32
    return %c0_i32, %c0_i32_0 : i32, i32
  }
  func.func @transform_6(%arg0: i32) -> (i32, i32) {
    %c0_i32 = arith.constant 0 : i32
    %c0_i32_0 = arith.constant 0 : i32
    return %arg0, %c0_i32 : i32, i32
  }
  func.func @transform_7(%arg0: i32) -> (i32, i32) {
    %c0_i32 = arith.constant 0 : i32
    %c0_i32_0 = arith.constant 0 : i32
    return %arg0, %c0_i32 : i32, i32
  }
}

</mosaic_0001>

<bundles_post_ra>
// kernel: twin_hybrid_forward.1
= control target key start
LH: loop header
LB: loop body
LE: loop exit
PB: predicated region body
PF: predicated region fallthrough
CT: control target
= control target key end

     0   :  { %13 = vsyncpa [#allocation3], 0  ;;  %s3200_s0 = inlined_call_operand.hbm [shape: f32[4,896], index: 0, kind: input, shape index: {}]   ;;  %s3201_s1 = inlined_call_operand.hbm [shape: f32[4,896], index: 1, kind: input, shape index: {}]   ;;  %s3202_s2 = inlined_call_operand.hbm [shape: bf16[896,256], index: 2, kind: input, shape index: {}]   ;;  %s3203_s3 = inlined_call_operand.vmem [shape: f32[1,256], index: 3, kind: input, shape index: {}]   ;;  %s3204_s4 = inlined_call_operand.hbm [shape: bf16[256,512], index: 4, kind: input, shape index: {}]   ;;  %s3205_s5 = inlined_call_operand.vmem [shape: f32[1,512], index: 5, kind: input, shape index: {}]   ;;  %s3206_s6 = inlined_call_operand.hbm [shape: f32[4,512], index: 6, kind: output, shape index: {0}]   ;;  %s3207_s7 = inlined_call_operand.hbm [shape: f32[4,512], index: 7, kind: output, shape index: {1}]  }
   0x1   :  { %14 = vsyncpa [#allocation6], 0 }
   0x2   :  { %15 = vsyncpa [#allocation9], 0 }
   0x3   :  { %16 = vsyncpa [#allocation4], 0 }
   0x4   :  { %17 = vsyncpa [#allocation12], 0  ;;  %s2445_s24 = smov [#allocation5]   ;;  %s2446_s26 = smov [#allocation2]  }
   0x5   :  { %s34_s25 = sshll.u32 %s2445_s24, 4  ;;  %s24_s27 = sshll.u32 %s2446_s26, 4  ;;  %s35_s25 = int_to_ptr.vmem [resolvable:$true] %s34_s25  ;;  %s25_s27 = int_to_ptr.vmem [resolvable:$true] %s24_s27 }
   0x6   :  { %s2303_s30 = scalar_lea.hbm %s3201_s1, 448 }
   0x7   :  { %p2304_p0 = scmp.ne.s32.totalorder %s3201_s1, %s2303_s30  ;;  %p2307_p1 = scmp.lt.u32.totalorder %s2303_s30, %s3201_s1 }
   0x9   :  { %p2309_p2 = pnand %p2307_p1, %p2304_p0 }
   0xb   :  { %2312 = shalt.err (!%p2309_p2)
}
   0xc   :  { %s2313_s12 = scalar_lea.vmem %s35_s25, 448  ;;  %p2318_p4 = scmp.lt.s32.totalorder %s35_s25, %s35_s25 }
   0xd   :  { %p2314_p3 = scmp.ne.s32.totalorder %s35_s25, %s2313_s12  ;;  %p2319_p5 = scmp.lt.s32.totalorder %s2313_s12, %s2313_s12 }
   0xf   :  { %p2320_p6 = por %p2319_p5, %p2318_p4 }
  0x11   :  { %p2321_p7 = pnand %p2320_p6, %p2314_p3 }
  0x13   :  { %2324 = shalt.err (!%p2321_p7)
}
  0x14   :  { %37 = dma.hbm_to_vmem [thread:$0]  %s3201_s1, 448, %s35_s25, [#allocation6]  }
  0x15   :  { %s2325_s17 = scalar_lea.hbm %s3200_s0, 448 }
  0x16   :  { %p2326_p8 = scmp.ne.s32.totalorder %s3200_s0, %s2325_s17  ;;  %p2329_p9 = scmp.lt.u32.totalorder %s2325_s17, %s3200_s0 }
  0x18   :  { %p2331_p10 = pnand %p2329_p9, %p2326_p8 }
  0x1a   :  { %2334 = shalt.err (!%p2331_p10)
}
  0x1b   :  { %s2335_s22 = scalar_lea.vmem %s25_s27, 448  ;;  %p2340_p12 = scmp.lt.s32.totalorder %s25_s27, %s25_s27 }
  0x1c   :  { %p2336_p11 = scmp.ne.s32.totalorder %s25_s27, %s2335_s22  ;;  %p2341_p13 = scmp.lt.s32.totalorder %s2335_s22, %s2335_s22 }
  0x1e   :  { %p2342_p0 = por %p2341_p13, %p2340_p12 }
  0x20   :  { %p2343_p1 = pnand %p2342_p0, %p2336_p11 }
  0x22   :  { %2346 = shalt.err (!%p2343_p1)
}
  0x23   :  { %27 = dma.hbm_to_vmem [thread:$0]  %s3200_s0, 448, %s25_s27, [#allocation3]  }
  0x24   :  { %s2447_s24 = smov [#allocation7]   ;;  %s2347_s29 = scalar_lea.hbm %s3202_s2, 14336 }
  0x25   :  { %s43_s25 = sshll.u32 %s2447_s24, 4  ;;  %p2348_p2 = scmp.ne.s32.totalorder %s3202_s2, %s2347_s29  ;;  %s44_s25 = int_to_ptr.vmem [resolvable:$true] %s43_s25 }
  0x26   :  { %p2351_p3 = scmp.lt.u32.totalorder %s2347_s29, %s3202_s2 }
  0x28   :  { %p2353_p4 = pnand %p2351_p3, %p2348_p2 }
  0x2a   :  { %2356 = shalt.err (!%p2353_p4)
}
  0x2b   :  { %s2357_s11 = scalar_lea.vmem %s44_s25, 14336  ;;  %p2362_p6 = scmp.lt.s32.totalorder %s44_s25, %s44_s25 }
  0x2c   :  { %p2358_p5 = scmp.ne.s32.totalorder %s44_s25, %s2357_s11  ;;  %p2363_p7 = scmp.lt.s32.totalorder %s2357_s11, %s2357_s11 }
  0x2e   :  { %p2364_p8 = por %p2363_p7, %p2362_p6 }
  0x30   :  { %p2365_p9 = pnand %p2364_p8, %p2358_p5 }
  0x32   :  { %2368 = shalt.err (!%p2365_p9)
}
  0x33   :  { %s2448_s0 = smov 128   ;;  %s2449_s27 = smov 8  }
  0x34   :  { %49 = dma.hbm_to_vmem [thread:$0]  %s3202_s2, 14336, %s44_s25, [#allocation6], %s2448_s0, %s2448_s0, %s2449_s27  }
  0x35   :  { %s2450_s14 = smov [#allocation8]   ;;  %s2369_s18 = scalar_lea.hbm %s3204_s4, 8192 }
  0x36   :  { %s57_s15 = sshll.u32 %s2450_s14, 4  ;;  %p2370_p10 = scmp.ne.s32.totalorder %s3204_s4, %s2369_s18  ;;  %s58_s15 = int_to_ptr.vmem [resolvable:$true] %s57_s15 }
  0x37   :  { %p2373_p11 = scmp.lt.u32.totalorder %s2369_s18, %s3204_s4 }
  0x39   :  { %p2375_p12 = pnand %p2373_p11, %p2370_p10 }
  0x3b   :  { %2378 = shalt.err (!%p2375_p12)
}
  0x3c   :  { %s2379_s1 = scalar_lea.vmem %s58_s15, 8192  ;;  %p2384_p0 = scmp.lt.s32.totalorder %s58_s15, %s58_s15 }
  0x3d   :  { %p2380_p13 = scmp.ne.s32.totalorder %s58_s15, %s2379_s1  ;;  %p2385_p1 = scmp.lt.s32.totalorder %s2379_s1, %s2379_s1 }
  0x3f   :  { %p2386_p2 = por %p2385_p1, %p2384_p0 }
  0x41   :  { %p2387_p3 = pnand %p2386_p2, %p2380_p13 }
  0x43   :  { %2390 = shalt.err (!%p2387_p3)
}
  0x44   :  { %s2451_s2 = smov 256   ;;  %s2452_s23 = smov 16  }
  0x45   :  { %63 = dma.hbm_to_vmem [thread:$0]  %s3204_s4, 8192, %s58_s15, [#allocation9], %s2451_s2, %s2451_s2, %s2452_s23  }
  0x46   :  { %2435 = dma.done.wait [#allocation3], 448  }
  0x47   :  { %2436 = vsyncadd [#allocation3], 4294966848 }
  0x48   :  { %2437 = dma.done.wait [#allocation6], 14784  }
  0x49   :  { %2438 = vsyncadd [#allocation6], 4294952512 }
  0x4a   :  { %2439 = dma.done.wait [#allocation9], 8192  }
  0x4b   :  { %2440 = vsyncadd [#allocation9], 4294959104  ;;  %v1983_v0 = vld [vmem:[#allocation7 + $0x4] ss:$8 sps:$4 sm:$0xff]   ;;  %v1985_v1 = vld [vmem:[#allocation7] ss:$8 sps:$4 sm:$0xff]  }
  0x4c   :  { %848 = vmatprep.subr.bf16.mxu0 %v1983_v0  ;;  %v1986_v2 = vld [vmem:[#allocation7 + $0x14] ss:$8 sps:$4 sm:$0xff]   ;;  %v1988_v3 = vld [vmem:[#allocation7 + $0x10] ss:$8 sps:$4 sm:$0xff]   ;;  %v1989_v4 = vld [vmem:[#allocation7 + $0x24] ss:$8 sps:$4 sm:$0xff]  }
  0x4d   :  { %849 = vmatpush1.bf16.msra.mxu0 %v1985_v1  ;;  %v1991_v5 = vld [vmem:[#allocation7 + $0x20] ss:$8 sps:$4 sm:$0xff]   ;;  %v1992_v6 = vld [vmem:[#allocation7 + $0x34] ss:$8 sps:$4 sm:$0xff]   ;;  %v1994_v7 = vld [vmem:[#allocation7 + $0x30] ss:$8 sps:$4 sm:$0xff]  }
  0x4e   :  { %850 = vmatprep.subr.bf16.mxu0 %v1986_v2  ;;  %v1995_v8 = vld [vmem:[#allocation7 + $0x44] ss:$8 sps:$4 sm:$0xff]   ;;  %v1997_v9 = vld [vmem:[#allocation7 + $0x40] ss:$8 sps:$4 sm:$0xff]   ;;  %v1998_v10 = vld [vmem:[#allocation7 + $0x54] ss:$8 sps:$4 sm:$0xff]  }
  0x4f   :  { %v2000_v11 = vld [vmem:[#allocation7 + $0x50] ss:$8 sps:$4 sm:$0xff]   ;;  %v2001_v12 = vld [vmem:[#allocation7 + $0x64] ss:$8 sps:$4 sm:$0xff]   ;;  %v2003_v15 = vld [vmem:[#allocation7 + $0x60] ss:$8 sps:$4 sm:$0xff]  }
  0x50   :  { %v257_v13 = vld [vmem:[#allocation2] sm:$0xff]  ;;  %v2004_v16 = vld [vmem:[#allocation7 + $0x74] ss:$8 sps:$4 sm:$0xff]   ;;  %v2006_v18 = vld [vmem:[#allocation7 + $0x70] ss:$8 sps:$4 sm:$0xff]  }
  0x51   :  { %851 = vmatpush1.bf16.msra.mxu0 %v1988_v3  ;;  %v264_v14 = vcombine.high %v257_v13, %v257_v13  ;;  %v2007_v19 = vld [vmem:[#allocation7 + $0x84] ss:$8 sps:$4 sm:$0xff]   ;;  %v2009_v20 = vld [vmem:[#allocation7 + $0x80] ss:$8 sps:$4 sm:$0xff]   ;;  %v2010_v21 = vld [vmem:[#allocation7 + $0x94] ss:$8 sps:$4 sm:$0xff]   ;;  %v270_v38 = vpack.c.bf16 %v257_v13, %v257_v13 }
  0x52   :  { %852 = vmatprep.subr.bf16.mxu0 %v1989_v4  ;;  %v2012_v22 = vld [vmem:[#allocation7 + $0x90] ss:$8 sps:$4 sm:$0xff]   ;;  %v2013_v23 = vld [vmem:[#allocation7 + $0xa4] ss:$8 sps:$4 sm:$0xff]   ;;  %v2015_v24 = vld [vmem:[#allocation7 + $0xa0] ss:$8 sps:$4 sm:$0xff]  }
  0x53   :  { %v271_v17 = vpack.c.bf16 %v264_v14, %v264_v14  ;;  %v2016_v25 = vld [vmem:[#allocation7 + $0xb4] ss:$8 sps:$4 sm:$0xff]   ;;  %v2018_v26 = vld [vmem:[#allocation7 + $0xb0] ss:$8 sps:$4 sm:$0xff]   ;;  %v2019_v27 = vld [vmem:[#allocation7 + $0xc4] ss:$8 sps:$4 sm:$0xff]  }
  0x54   :  { %v2021_v28 = vld [vmem:[#allocation7 + $0xc0] ss:$8 sps:$4 sm:$0xff]   ;;  %v2544_v29 = vld [vmem:[#allocation7 + $0xd4] ss:$8 sps:$4 sm:$0xff]   ;;  %v2546_v30 = vld [vmem:[#allocation7 + $0xd0] ss:$8 sps:$4 sm:$0xff]  }
  0x55   :  { %853 = vmatpush1.bf16.msra.mxu0 %v1991_v5  ;;  %880 = vmatprep.mubr.bf16.mxu0 %v271_v17  ;;  %v2549_v31 = vld [vmem:[#allocation7 + $0xe4] ss:$8 sps:$4 sm:$0xff]   ;;  %v2552_v32 = vld [vmem:[#allocation7 + $0xe0] ss:$8 sps:$4 sm:$0xff]   ;;  %v2555_v33 = vld [vmem:[#allocation7 + $0xf4] ss:$8 sps:$4 sm:$0xff]  }
  0x56   :  { %854 = vmatprep.subr.bf16.mxu0 %v1992_v6  ;;  %v2557_v34 = vld [vmem:[#allocation2 + $0x8] sm:$0xff]  ;;  %v2565_v37 = vld [vmem:[#allocation7 + $0x104] ss:$8 sps:$4 sm:$0xff]   ;;  %v2568_v39 = vld [vmem:[#allocation7 + $0x100] ss:$8 sps:$4 sm:$0xff]  }
  0x57   :  { %v2560_v35 = vld [vmem:[#allocation7 + $0xf0] ss:$8 sps:$4 sm:$0xff]   ;;  %v265_v36 = vcombine.high %v2557_v34, %v2557_v34  ;;  %v2571_v41 = vld [vmem:[#allocation7 + $0x114] ss:$8 sps:$4 sm:$0xff]   ;;  %v2576_v43 = vld [vmem:[#allocation7 + $0x124] ss:$8 sps:$4 sm:$0xff]  }
  0x58   :  { %v2574_v42 = vld [vmem:[#allocation7 + $0x110] ss:$8 sps:$4 sm:$0xff]   ;;  %v2580_v44 = vld [vmem:[#allocation7 + $0x120] ss:$8 sps:$4 sm:$0xff]   ;;  %v2582_v45 = vld [vmem:[#allocation7 + $0x134] ss:$8 sps:$4 sm:$0xff]  }
  0x59   :  { %855 = vmatpush1.bf16.msra.mxu0 %v1994_v7  ;;  %v273_v40 = vpack.c.bf16 %v265_v36, %v265_v36  ;;  %v2586_v46 = vld [vmem:[#allocation7 + $0x130] ss:$8 sps:$4 sm:$0xff]   ;;  %v2588_v47 = vld [vmem:[#allocation7 + $0x144] ss:$8 sps:$4 sm:$0xff]   ;;  %v2592_v48 = vld [vmem:[#allocation7 + $0x140] ss:$8 sps:$4 sm:$0xff]  }
  0x5a   :  { %856 = vmatprep.subr.bf16.mxu0 %v1995_v8  ;;  %v2594_v49 = vld [vmem:[#allocation7 + $0x154] ss:$8 sps:$4 sm:$0xff]   ;;  %v2598_v50 = vld [vmem:[#allocation7 + $0x150] ss:$8 sps:$4 sm:$0xff]   ;;  %v2600_v51 = vld [vmem:[#allocation7 + $0x164] ss:$8 sps:$4 sm:$0xff]  }
  0x5b   :  { %v2604_v52 = vld [vmem:[#allocation7 + $0x160] ss:$8 sps:$4 sm:$0xff]   ;;  %v2606_v53 = vld [vmem:[#allocation7 + $0x174] ss:$8 sps:$4 sm:$0xff]   ;;  %v2610_v54 = vld [vmem:[#allocation7 + $0x170] ss:$8 sps:$4 sm:$0xff]  }
  0x5c   :  { %v2612_v55 = vld [vmem:[#allocation7 + $0x184] ss:$8 sps:$4 sm:$0xff]   ;;  %v2615_v56 = vld [vmem:[#allocation7 + $0x180] ss:$8 sps:$4 sm:$0xff]   ;;  %v2618_v57 = vld [vmem:[#allocation7 + $0x194] ss:$8 sps:$4 sm:$0xff]  }
  0x5d   :  { %857 = vmatpush1.bf16.msra.mxu0 %v1997_v9  ;;  %v2621_v58 = vld [vmem:[#allocation8 + $0x4] ss:$16 sps:$4 sm:$0xff]   ;;  %v2623_v59 = vld [vmem:[#allocation8] ss:$16 sps:$4 sm:$0xff]  }
  0x5e   :  { %858 = vmatprep.subr.bf16.mxu0 %v1998_v10  ;;  %v2625_v60 = vld [vmem:[#allocation8 + $0x24] ss:$16 sps:$4 sm:$0xff]   ;;  %v2628_v61 = vld [vmem:[#allocation7 + $0x190] ss:$8 sps:$4 sm:$0xff]   ;;  %1357 = vmatprep.subr.bf16.mxu1 %v2621_v58  ;;  %v2641_v1 = vld [vmem:[#allocation7 + $0x1a0] ss:$8 sps:$4 sm:$0xff]  }
  0x5f   :  { %v2631_v62 = vld [vmem:[#allocation7 + $0x1a4] ss:$8 sps:$4 sm:$0xff]   ;;  %1358 = vmatpush1.bf16.msra.mxu1 %v2623_v59  ;;  %v2635_v63 = vld [vmem:[#allocation8 + $0x20] ss:$16 sps:$4 sm:$0xff]   ;;  %v2644_v2 = vld [vmem:[#allocation7 + $0x1b4] ss:$8 sps:$4 sm:$0xff]  }
  0x60   :  { %1359 = vmatprep.subr.bf16.mxu1 %v2625_v60  ;;  %v2638_v0 = vld [vmem:[#allocation8 + $0x44] ss:$16 sps:$4 sm:$0xff]   ;;  %v2647_v3 = vld [vmem:[#allocation8 + $0x40] ss:$16 sps:$4 sm:$0xff]  }
  0x61   :  { %859 = vmatpush1.bf16.msra.mxu0 %v2000_v11  ;;  %v2650_v4 = vld [vmem:[#allocation8 + $0x64] ss:$16 sps:$4 sm:$0xff]   ;;  %v2653_v5 = vld [vmem:[#allocation7 + $0x1b0] ss:$8 sps:$4 sm:$0xff]   ;;  %v2665_v9 = vld [vmem:[#allocation7 + $0x1c0] ss:$8 sps:$4 sm:$0xff]  }
  0x62   :  { %860 = vmatprep.subr.bf16.mxu0 %v2001_v12  ;;  %v2656_v6 = vld [vmem:[#allocation7 + $0x1c4] ss:$8 sps:$4 sm:$0xff]   ;;  %v2659_v7 = vld [vmem:[#allocation8 + $0x60] ss:$16 sps:$4 sm:$0xff]   ;;  %3279 = vst [vmem:[#allocation18_spill] sm:$0xff] %v2665_v9 }
  0x63   :  { %1360 = vmatpush1.bf16.msra.mxu1 %v2635_v63  ;;  %v2662_v8 = vld [vmem:[#allocation8 + $0x84] ss:$16 sps:$4 sm:$0xff]   ;;  %v2671_v11 = vld [vmem:[#allocation8 + $0x80] ss:$16 sps:$4 sm:$0xff]  }
  0x64   :  { %1361 = vmatprep.subr.bf16.mxu1 %v2638_v0  ;;  %v2668_v10 = vld [vmem:[#allocation7 + $0x1d4] ss:$8 sps:$4 sm:$0xff]   ;;  %v2677_v13 = vld [vmem:[#allocation7 + $0x1d0] ss:$8 sps:$4 sm:$0xff]   ;;  %v2680_v14 = vld [vmem:[#allocation7 + $0x1e4] ss:$8 sps:$4 sm:$0xff]  }
  0x65   :  { %861 = vmatpush1.bf16.msra.mxu0 %v2003_v15  ;;  %3280 = vst [vmem:[#allocation19_spill] sm:$0xff] %v2668_v10  ;;  %v2674_v12 = vld [vmem:[#allocation8 + $0xa4] ss:$16 sps:$4 sm:$0xff]   ;;  %3281 = vst [vmem:[#allocation20_spill] sm:$0xff] %v2677_v13  ;;  %v2683_v15 = vld [vmem:[#allocation8 + $0xa0] ss:$16 sps:$4 sm:$0xff]  }
  0x66   :  { %862 = vmatprep.subr.bf16.mxu0 %v2004_v16  ;;  %3282 = vst [vmem:[#allocation21_spill] sm:$0xff] %v2680_v14  ;;  %v2686_v16 = vld [vmem:[#allocation8 + $0xc4] ss:$16 sps:$4 sm:$0xff]   ;;  %v2689_v17 = vld [vmem:[#allocation7 + $0x1e0] ss:$8 sps:$4 sm:$0xff]  }
  0x67   :  { %1362 = vmatpush1.bf16.msra.mxu1 %v2647_v3  ;;  %3283 = vst [vmem:[#allocation22_spill] sm:$0xff] %v2689_v17 }
  0x68   :  { %1363 = vmatprep.subr.bf16.mxu1 %v2650_v4 }
  0x69   :  { %863 = vmatpush1.bf16.msra.mxu0 %v2006_v18  ;;  %v2692_v18 = vld [vmem:[#allocation7 + $0x1f4] ss:$8 sps:$4 sm:$0xff]  }
  0x6a   :  { %864 = vmatprep.subr.bf16.mxu0 %v2007_v19  ;;  %3284 = vst [vmem:[#allocation23_spill] sm:$0xff] %v2692_v18  ;;  %v2694_v19 = vld [vmem:[#allocation2 + $0x10] sm:$0xff] }
  0x6b   :  { %1364 = vmatpush1.bf16.msra.mxu1 %v2659_v7 }
  0x6c   :  { %1365 = vmatprep.subr.bf16.mxu1 %v2662_v8 }
  0x6d   :  { %865 = vmatpush1.bf16.msra.mxu0 %v2009_v20  ;;  %v2697_v20 = vld [vmem:[#allocation8 + $0xc0] ss:$16 sps:$4 sm:$0xff]  }
  0x6e   :  { %866 = vmatprep.subr.bf16.mxu0 %v2010_v21  ;;  %v2700_v21 = vld [vmem:[#allocation8 + $0xe4] ss:$16 sps:$4 sm:$0xff]  }
  0x6f   :  { %1366 = vmatpush1.bf16.msra.mxu1 %v2671_v11 }
  0x70   :  { %1367 = vmatprep.subr.bf16.mxu1 %v2674_v12 }
  0x71   :  { %867 = vmatpush1.bf16.msra.mxu0 %v2012_v22  ;;  %v2703_v22 = vld [vmem:[#allocation7 + $0x1f0] ss:$8 sps:$4 sm:$0xff]  }
  0x72   :  { %868 = vmatprep.subr.bf16.mxu0 %v2013_v23  ;;  %3285 = vst [vmem:[#allocation24_spill] sm:$0xff] %v2703_v22  ;;  %v266_v23 = vcombine.high %v2694_v19, %v2694_v19 }
  0x73   :  { %1368 = vmatpush1.bf16.msra.mxu1 %v2683_v15 }
  0x74   :  { %1369 = vmatprep.subr.bf16.mxu1 %v2686_v16  ;;  %v275_v36 = vpack.c.bf16 %v266_v23, %v266_v23  ;;  %v2734_v23 = vld [vmem:[#allocation7 + $0x224] ss:$8 sps:$4 sm:$0xff]  }
  0x75   :  { %869 = vmatpush1.bf16.msra.mxu0 %v2015_v24  ;;  %v2708_v24 = vld [vmem:[#allocation7 + $0x204] ss:$8 sps:$4 sm:$0xff]   ;;  %3290 = vst [vmem:[#allocation29_spill] sm:$0xff] %v2734_v23 }
  0x76   :  { %870 = vmatprep.subr.bf16.mxu0 %v2016_v25  ;;  %3286 = vst [vmem:[#allocation25_spill] sm:$0xff] %v2708_v24  ;;  %v2711_v25 = vld [vmem:[#allocation8 + $0xe0] ss:$16 sps:$4 sm:$0xff]  }
  0x77   :  { %1370 = vmatpush1.bf16.msra.mxu1 %v2697_v20 }
  0x78   :  { %1371 = vmatprep.subr.bf16.mxu1 %v2700_v21 }
  0x79   :  { %871 = vmatpush1.bf16.msra.mxu0 %v2018_v26  ;;  %v272_v26 = vpack.c.bf16 %v2557_v34, %v2557_v34  ;;  %v2728_v34 = vld [vmem:[#allocation8 + $0x124] ss:$16 sps:$4 sm:$0xff]  }
  0x7a   :  { %872 = vmatprep.subr.bf16.mxu0 %v2019_v27  ;;  %v2716_v27 = vld [vmem:[#allocation8 + $0x104] ss:$16 sps:$4 sm:$0xff]  }
  0x7b   :  { %1372 = vmatpush1.bf16.msra.mxu1 %v2711_v25 }
  0x7c   :  { %1373 = vmatprep.subr.bf16.mxu1 %v2716_v27 }
  0x7d   :  { %873 = vmatpush1.bf16.msra.mxu0 %v2021_v28  ;;  %v2719_v28 = vld [vmem:[#allocation7 + $0x200] ss:$8 sps:$4 sm:$0xff]  }
  0x7e   :  { %874 = vmatprep.subr.bf16.mxu0 %v2544_v29  ;;  %3287 = vst [vmem:[#allocation26_spill] sm:$0xff] %v2719_v28 }
  0x81   :  { %875 = vmatpush1.bf16.msra.mxu0 %v2546_v30 }
  0x82   :  { %876 = vmatprep.subr.bf16.mxu0 %v2549_v31 }
  0x85   :  { %877 = vmatpush1.bf16.msra.mxu0 %v2552_v32 }
  0x86   :  { %878 = vmatprep.subr.bf16.mxu0 %v2555_v33 }
  0x89   :  { %879 = vmatpush1.bf16.msra.mxu0 %v2560_v35 }
  0x8a   :  { %889 = vmatprep.subr.bf16.mxu0 %v2565_v37 }
  0x8c   :  { %881 = vmatmul.mubr.bf16.vlgmr.msra.gmra.mrb[0].mxu0 %v270_v38  ;;  %v2722_v38 = vld [vmem:[#allocation7 + $0x214] ss:$8 sps:$4 sm:$0xff]  }
  0x8d   :  { %890 = vmatpush1.bf16.msra.mxu0 %v2568_v39  ;;  %921 = vmatprep.mubr.bf16.mxu0 %v273_v40  ;;  %3288 = vst [vmem:[#allocation27_spill] sm:$0xff] %v2722_v38  ;;  %v2725_v40 = vld [vmem:[#allocation8 + $0x100] ss:$16 sps:$4 sm:$0xff]  }
  0x8e   :  { %891 = vmatprep.subr.bf16.mxu0 %v2571_v41  ;;  %1374 = vmatpush1.bf16.msra.mxu1 %v2725_v40 }
  0x8f   :  { %1375 = vmatprep.subr.bf16.mxu1 %v2728_v34 }
  0x91   :  { %892 = vmatpush1.bf16.msra.mxu0 %v2574_v42 }
  0x92   :  { %893 = vmatprep.subr.bf16.mxu0 %v2576_v43 }
  0x95   :  { %894 = vmatpush1.bf16.msra.mxu0 %v2580_v44 }
  0x96   :  { %895 = vmatprep.subr.bf16.mxu0 %v2582_v45 }
  0x99   :  { %896 = vmatpush1.bf16.msra.mxu0 %v2586_v46 }
  0x9a   :  { %897 = vmatprep.subr.bf16.mxu0 %v2588_v47 }
  0x9d   :  { %898 = vmatpush1.bf16.msra.mxu0 %v2592_v48 }
  0x9e   :  { %899 = vmatprep.subr.bf16.mxu0 %v2594_v49 }
  0xa1   :  { %900 = vmatpush1.bf16.msra.mxu0 %v2598_v50 }
  0xa2   :  { %901 = vmatprep.subr.bf16.mxu0 %v2600_v51 }
  0xa5   :  { %902 = vmatpush1.bf16.msra.mxu0 %v2604_v52 }
  0xa6   :  { %903 = vmatprep.subr.bf16.mxu0 %v2606_v53 }
  0xa9   :  { %904 = vmatpush1.bf16.msra.mxu0 %v2610_v54 }
  0xaa   :  { %905 = vmatprep.subr.bf16.mxu0 %v2612_v55 }
  0xad   :  { %906 = vmatpush1.bf16.msra.mxu0 %v2615_v56 }
  0xae   :  { %907 = vmatprep.subr.bf16.mxu0 %v2618_v57 }
  0xb1   :  { %908 = vmatpush1.bf16.msra.mxu0 %v2628_v61 }
  0xb2   :  { %909 = vmatprep.subr.bf16.mxu0 %v2631_v62 }
  0xb5   :  { %910 = vmatpush1.bf16.msra.mxu0 %v2641_v1 }
  0xb6   :  { %911 = vmatprep.subr.bf16.mxu0 %v2644_v2 }
  0xb9   :  { %912 = vmatpush1.bf16.msra.mxu0 %v2653_v5 }
  0xba   :  { %913 = vmatprep.subr.bf16.mxu0 %v2656_v6 }
  0xbd   :  { %914 = vmatpush1.bf16.msra.mxu0 %v2665_v9  ;;  %v3248_v9 = vmov 0  }
  0xbe   :  { %915 = vmatprep.subr.bf16.mxu0 %v2668_v10  ;;  %v2778_v10 = vld [vmem:[#allocation7 + $0x260] ss:$8 sps:$4 sm:$0xff]  }
  0xbf   :  { %3299 = vst [vmem:[#allocation38_spill] sm:$0xff] %v2778_v10 }
  0xc1   :  { %916 = vmatpush1.bf16.msra.mxu0 %v2677_v13  ;;  %v2768_v13 = vld [vmem:[#allocation7 + $0x254] ss:$8 sps:$4 sm:$0xff]  }
  0xc2   :  { %917 = vmatprep.subr.bf16.mxu0 %v2680_v14  ;;  %v2765_v14 = vld [vmem:[#allocation7 + $0x240] ss:$8 sps:$4 sm:$0xff]   ;;  %3296 = vst [vmem:[#allocation35_spill] sm:$0xff] %v2768_v13 }
  0xc3   :  { %3295 = vst [vmem:[#allocation34_spill] sm:$0xff] %v2765_v14 }
  0xc5   :  { %918 = vmatpush1.bf16.msra.mxu0 %v2689_v17  ;;  %v2755_v17 = vld [vmem:[#allocation7 + $0x230] ss:$8 sps:$4 sm:$0xff]  }
  0xc6   :  { %919 = vmatprep.subr.bf16.mxu0 %v2692_v18  ;;  %v2731_v18 = vld [vmem:[#allocation7 + $0x210] ss:$8 sps:$4 sm:$0xff]   ;;  %3293 = vst [vmem:[#allocation32_spill] sm:$0xff] %v2755_v17 }
  0xc7   :  { %3289 = vst [vmem:[#allocation28_spill] sm:$0xff] %v2731_v18 }
  0xc9   :  { %920 = vmatpush1.bf16.msra.mxu0 %v2703_v22  ;;  %v2743_v22 = vld [vmem:[#allocation7 + $0x220] ss:$8 sps:$4 sm:$0xff]  }
  0xca   :  { %930 = vmatprep.subr.bf16.mxu0 %v2708_v24  ;;  %v2737_v24 = vld [vmem:[#allocation8 + $0x120] ss:$16 sps:$4 sm:$0xff]   ;;  %3291 = vst [vmem:[#allocation30_spill] sm:$0xff] %v2743_v22 }
  0xcb   :  { %1376 = vmatpush1.bf16.msra.mxu1 %v2737_v24 }
  0xcc   :  { %922 = vmatmul.mubr.bf16.vlgmr.msra.gmra.mrb[0].mxu0 %v272_v26  ;;  %v2740_v26 = vld [vmem:[#allocation8 + $0x144] ss:$16 sps:$4 sm:$0xff]  }
  0xcd   :  { %931 = vmatpush1.bf16.msra.mxu0 %v2719_v28  ;;  %962 = vmatprep.mubr.bf16.mxu0 %v275_v36  ;;  %v2746_v28 = vld [vmem:[#allocation7 + $0x234] ss:$8 sps:$4 sm:$0xff]   ;;  %v2749_v36 = vld [vmem:[#allocation8 + $0x140] ss:$16 sps:$4 sm:$0xff]  }
  0xce   :  { %932 = vmatprep.subr.bf16.mxu0 %v2722_v38  ;;  %3292 = vst [vmem:[#allocation31_spill] sm:$0xff] %v2746_v28  ;;  %1377 = vmatprep.subr.bf16.mxu1 %v2740_v26  ;;  %v2752_v38 = vld [vmem:[#allocation8 + $0x164] ss:$16 sps:$4 sm:$0xff]  }
  0xcf   :  { %1378 = vmatpush1.bf16.msra.mxu1 %v2749_v36 }
  0xd0   :  { %1379 = vmatprep.subr.bf16.mxu1 %v2752_v38 }
  0xd1   :  { %933 = vmatpush1.bf16.msra.mxu0 %v2731_v18  ;;  %v2758_v18 = vld [vmem:[#allocation7 + $0x244] ss:$8 sps:$4 sm:$0xff]  }
  0xd2   :  { %934 = vmatprep.subr.bf16.mxu0 %v2734_v23  ;;  %3294 = vst [vmem:[#allocation33_spill] sm:$0xff] %v2758_v18  ;;  %v2761_v23 = vld [vmem:[#allocation8 + $0x160] ss:$16 sps:$4 sm:$0xff]  }
  0xd3   :  { %1380 = vmatpush1.bf16.msra.mxu1 %v2761_v23 }
  0xd5   :  { %935 = vmatpush1.bf16.msra.mxu0 %v2743_v22  ;;  %v2775_v22 = vld [vmem:[#allocation7 + $0x264] ss:$8 sps:$4 sm:$0xff]  }
  0xd6   :  { %936 = vmatprep.subr.bf16.mxu0 %v2746_v28  ;;  %v2772_v28 = vld [vmem:[#allocation7 + $0x250] ss:$8 sps:$4 sm:$0xff]   ;;  %3298 = vst [vmem:[#allocation37_spill] sm:$0xff] %v2775_v22 }
  0xd7   :  { %3297 = vst [vmem:[#allocation36_spill] sm:$0xff] %v2772_v28 }
  0xd9   :  { %937 = vmatpush1.bf16.msra.mxu0 %v2755_v17  ;;  %v2781_v17 = vld [vmem:[#allocation7 + $0x274] ss:$8 sps:$4 sm:$0xff]  }
  0xda   :  { %938 = vmatprep.subr.bf16.mxu0 %v2758_v18  ;;  %3300 = vst [vmem:[#allocation39_spill] sm:$0xff] %v2781_v17  ;;  %v2784_v18 = vld [vmem:[#allocation7 + $0x270] ss:$8 sps:$4 sm:$0xff]  }
  0xdb   :  { %3301 = vst [vmem:[#allocation40_spill] sm:$0xff] %v2784_v18 }
  0xdd   :  { %939 = vmatpush1.bf16.msra.mxu0 %v2765_v14  ;;  %v2787_v14 = vld [vmem:[#allocation7 + $0x284] ss:$8 sps:$4 sm:$0xff]  }
  0xde   :  { %940 = vmatprep.subr.bf16.mxu0 %v2768_v13  ;;  %3302 = vst [vmem:[#allocation41_spill] sm:$0xff] %v2787_v14  ;;  %v2790_v13 = vld [vmem:[#allocation7 + $0x280] ss:$8 sps:$4 sm:$0xff]  }
  0xdf   :  { %3303 = vst [vmem:[#allocation42_spill] sm:$0xff] %v2790_v13 }
  0xe1   :  { %941 = vmatpush1.bf16.msra.mxu0 %v2772_v28  ;;  %v2793_v28 = vld [vmem:[#allocation7 + $0x294] ss:$8 sps:$4 sm:$0xff]  }
  0xe2   :  { %942 = vmatprep.subr.bf16.mxu0 %v2775_v22  ;;  %3304 = vst [vmem:[#allocation43_spill] sm:$0xff] %v2793_v28  ;;  %v2796_v22 = vld [vmem:[#allocation7 + $0x290] ss:$8 sps:$4 sm:$0xff]  }
  0xe3   :  { %3305 = vst [vmem:[#allocation44_spill] sm:$0xff] %v2796_v22 }
  0xe5   :  { %943 = vmatpush1.bf16.msra.mxu0 %v2778_v10  ;;  %v2799_v10 = vld [vmem:[#allocation7 + $0x2a4] ss:$8 sps:$4 sm:$0xff]  }
  0xe6   :  { %944 = vmatprep.subr.bf16.mxu0 %v2781_v17  ;;  %3306 = vst [vmem:[#allocation45_spill] sm:$0xff] %v2799_v10  ;;  %v2802_v17 = vld [vmem:[#allocation7 + $0x2a0] ss:$8 sps:$4 sm:$0xff]  }
  0xe7   :  { %3307 = vst [vmem:[#allocation46_spill] sm:$0xff] %v2802_v17 }
  0xe9   :  { %945 = vmatpush1.bf16.msra.mxu0 %v2784_v18  ;;  %v2805_v18 = vld [vmem:[#allocation7 + $0x2b4] ss:$8 sps:$4 sm:$0xff]  }
  0xea   :  { %946 = vmatprep.subr.bf16.mxu0 %v2787_v14  ;;  %3308 = vst [vmem:[#allocation47_spill] sm:$0xff] %v2805_v18  ;;  %v2808_v14 = vld [vmem:[#allocation7 + $0x2b0] ss:$8 sps:$4 sm:$0xff]  }
  0xeb   :  { %3309 = vst [vmem:[#allocation48_spill] sm:$0xff] %v2808_v14 }
  0xed   :  { %947 = vmatpush1.bf16.msra.mxu0 %v2790_v13  ;;  %v2811_v13 = vld [vmem:[#allocation7 + $0x2c4] ss:$8 sps:$4 sm:$0xff]  }
  0xee   :  { %948 = vmatprep.subr.bf16.mxu0 %v2793_v28  ;;  %3310 = vst [vmem:[#allocation49_spill] sm:$0xff] %v2811_v13  ;;  %v2814_v28 = vld [vmem:[#allocation7 + $0x2c0] ss:$8 sps:$4 sm:$0xff]  }
  0xef   :  { %3311 = vst [vmem:[#allocation50_spill] sm:$0xff] %v2814_v28 }
  0xf1   :  { %949 = vmatpush1.bf16.msra.mxu0 %v2796_v22  ;;  %v2817_v22 = vld [vmem:[#allocation7 + $0x2d4] ss:$8 sps:$4 sm:$0xff]  }
  0xf2   :  { %950 = vmatprep.subr.bf16.mxu0 %v2799_v10  ;;  %3312 = vst [vmem:[#allocation51_spill] sm:$0xff] %v2817_v22  ;;  %v2820_v10 = vld [vmem:[#allocation7 + $0x2d0] ss:$8 sps:$4 sm:$0xff]  }
  0xf3   :  { %3313 = vst [vmem:[#allocation52_spill] sm:$0xff] %v2820_v10 }
  0xf5   :  { %951 = vmatpush1.bf16.msra.mxu0 %v2802_v17  ;;  %v2823_v17 = vld [vmem:[#allocation7 + $0x2e4] ss:$8 sps:$4 sm:$0xff]  }
  0xf6   :  { %952 = vmatprep.subr.bf16.mxu0 %v2805_v18  ;;  %3314 = vst [vmem:[#allocation53_spill] sm:$0xff] %v2823_v17  ;;  %v2826_v18 = vld [vmem:[#allocation7 + $0x2e0] ss:$8 sps:$4 sm:$0xff]  }
  0xf7   :  { %3315 = vst [vmem:[#allocation54_spill] sm:$0xff] %v2826_v18 }
  0xf9   :  { %953 = vmatpush1.bf16.msra.mxu0 %v2808_v14  ;;  %v2829_v14 = vld [vmem:[#allocation7 + $0x2f4] ss:$8 sps:$4 sm:$0xff]  }
  0xfa   :  { %954 = vmatprep.subr.bf16.mxu0 %v2811_v13  ;;  %3316 = vst [vmem:[#allocation55_spill] sm:$0xff] %v2829_v14  ;;  %v2832_v13 = vld [vmem:[#allocation7 + $0x2f0] ss:$8 sps:$4 sm:$0xff]  }
  0xfd   :  { %955 = vmatpush1.bf16.msra.mxu0 %v2814_v28  ;;  %v2835_v28 = vld [vmem:[#allocation7 + $0x304] ss:$8 sps:$4 sm:$0xff]  }
  0xfe   :  { %956 = vmatprep.subr.bf16.mxu0 %v2817_v22  ;;  %3317 = vst [vmem:[#allocation56_spill] sm:$0xff] %v2835_v28  ;;  %v274_v22 = vpack.c.bf16 %v2694_v19, %v2694_v19  ;;  %v2853_v19 = vld [vmem:[#allocation7 + $0x320] ss:$8 sps:$4 sm:$0xff]  }
  0xff   :  { %3322 = vst [vmem:[#allocation61_spill] sm:$0xff] %v2853_v19 }
 0x101   :  { %957 = vmatpush1.bf16.msra.mxu0 %v2820_v10  ;;  %v2840_v10 = vld [vmem:[#allocation7 + $0x300] ss:$8 sps:$4 sm:$0xff]  }
 0x102   :  { %958 = vmatprep.subr.bf16.mxu0 %v2823_v17  ;;  %3318 = vst [vmem:[#allocation57_spill] sm:$0xff] %v2840_v10  ;;  %v2843_v17 = vld [vmem:[#allocation7 + $0x314] ss:$8 sps:$4 sm:$0xff]  }
 0x103   :  { %3319 = vst [vmem:[#allocation58_spill] sm:$0xff] %v2843_v17 }
 0x105   :  { %959 = vmatpush1.bf16.msra.mxu0 %v2826_v18  ;;  %v2846_v18 = vld [vmem:[#allocation7 + $0x310] ss:$8 sps:$4 sm:$0xff]  }
 0x106   :  { %960 = vmatprep.subr.bf16.mxu0 %v2829_v14  ;;  %3320 = vst [vmem:[#allocation59_spill] sm:$0xff] %v2846_v18  ;;  %v2850_v14 = vld [vmem:[#allocation7 + $0x324] ss:$8 sps:$4 sm:$0xff]  }
 0x107   :  { %3321 = vst [vmem:[#allocation60_spill] sm:$0xff] %v2850_v14 }
 0x109   :  { %961 = vmatpush1.bf16.msra.mxu0 %v2832_v13 }
 0x10a   :  { %971 = vmatprep.subr.bf16.mxu0 %v2835_v28  ;;  %v2856_v28 = vld [vmem:[#allocation7 + $0x334] ss:$8 sps:$4 sm:$0xff]  }
 0x10b   :  { %3323 = vst [vmem:[#allocation62_spill] sm:$0xff] %v2856_v28 }
 0x10c   :  { %963 = vmatmul.mubr.bf16.vlgmr.msra.gmra.mrb[0].mxu0 %v274_v22  ;;  %v2859_v22 = vld [vmem:[#allocation7 + $0x330] ss:$8 sps:$4 sm:$0xff]  }
 0x10d   :  { %972 = vmatpush1.bf16.msra.mxu0 %v2840_v10  ;;  %1003 = vmatprep.mubr.bf16.mxu0 %v3248_v9  ;;  %3324 = vst [vmem:[#allocation63_spill] sm:$0xff] %v2859_v22  ;;  %v2862_v10 = vld [vmem:[#allocation7 + $0x344] ss:$8 sps:$4 sm:$0xff]   ;;  %v2865_v9 = vld [vmem:[#allocation7 + $0x340] ss:$8 sps:$4 sm:$0xff]  }
 0x10e   :  { %973 = vmatprep.subr.bf16.mxu0 %v2843_v17  ;;  %3325 = vst [vmem:[#allocation64_spill] sm:$0xff] %v2862_v10  ;;  %3326 = vst [vmem:[#allocation65_spill] sm:$0xff] %v2865_v9  ;;  %v260_v17 = vld [vmem:[#allocation2 + $0x18] sm:$0xf] }
 0x111   :  { %974 = vmatpush1.bf16.msra.mxu0 %v2846_v18  ;;  %v2868_v18 = vld [vmem:[#allocation7 + $0x354] ss:$8 sps:$4 sm:$0xff]  }
 0x112   :  { %975 = vmatprep.subr.bf16.mxu0 %v2850_v14  ;;  %v2871_v14 = vld [vmem:[#allocation7 + $0x350] ss:$8 sps:$4 sm:$0xff]  }
 0x115   :  { %976 = vmatpush1.bf16.msra.mxu0 %v2853_v19  ;;  %v2874_v19 = vld [vmem:[#allocation7 + $0x364] ss:$8 sps:$4 sm:$0xff]  }
 0x116   :  { %977 = vmatprep.subr.bf16.mxu0 %v2856_v28  ;;  %v2877_v28 = vld [vmem:[#allocation7 + $0x360] ss:$8 sps:$4 sm:$0xff]  }
 0x119   :  { %978 = vmatpush1.bf16.msra.mxu0 %v2859_v22  ;;  %v2880_v22 = vld [vmem:[#allocation7 + $0x374] ss:$8 sps:$4 sm:$0xff]  }
 0x11a   :  { %979 = vmatprep.subr.bf16.mxu0 %v2862_v10  ;;  %v2883_v10 = vld [vmem:[#allocation7 + $0x370] ss:$8 sps:$4 sm:$0xff]  }
 0x11d   :  { %980 = vmatpush1.bf16.msra.mxu0 %v2865_v9  ;;  %v276_v9 = vpack.c.bf16 %v260_v17, %v260_v17 }
 0x11e   :  { %981 = vmatprep.subr.bf16.mxu0 %v2868_v18 }
 0x121   :  { %982 = vmatpush1.bf16.msra.mxu0 %v2871_v14 }
 0x122   :  { %983 = vmatprep.subr.bf16.mxu0 %v2874_v19 }
 0x125   :  { %984 = vmatpush1.bf16.msra.mxu0 %v2877_v28 }
 0x126   :  { %985 = vmatprep.subr.bf16.mxu0 %v2880_v22 }
 0x129   :  { %986 = vmatpush1.bf16.msra.mxu0 %v2883_v10 }
 0x12a   :  { %1641 = vmatprep.subr.bf16.mxu0 %v2621_v58  ;;  %v2190_v58 = vld [vmem:[#allocation8 + $0x184] ss:$16 sps:$4 sm:$0xff]  }
 0x12b   :  { %1381 = vmatprep.subr.bf16.mxu1 %v2190_v58 }
 0x12c   :  { %1004 = vmatmul.mubr.bf16.vlgmr.msra.gmra.mrb[0].mxu0 %v276_v9  ;;  %v278_v9 = vlaneseq }
 0x12d   :  { %1642 = vmatpush1.bf16.msra.mxu0 %v2623_v59  ;;  %v2192_v59 = vld [vmem:[#allocation8 + $0x180] ss:$16 sps:$4 sm:$0xff]  }
 0x12e   :  { %1643 = vmatprep.subr.bf16.mxu0 %v2625_v60  ;;  %1382 = vmatpush1.bf16.msra.mxu1 %v2192_v59  ;;  %v2193_v60 = vld [vmem:[#allocation8 + $0x1a4] ss:$16 sps:$4 sm:$0xff]  }
 0x12f   :  { %1383 = vmatprep.subr.bf16.mxu1 %v2193_v60 }
 0x131   :  { %1644 = vmatpush1.bf16.msra.mxu0 %v2635_v63  ;;  %v2195_v63 = vld [vmem:[#allocation8 + $0x1a0] ss:$16 sps:$4 sm:$0xff]  }
 0x132   :  { %1645 = vmatprep.subr.bf16.mxu0 %v2638_v0  ;;  %1384 = vmatpush1.bf16.msra.mxu1 %v2195_v63  ;;  %v2196_v0 = vld [vmem:[#allocation8 + $0x1c4] ss:$16 sps:$4 sm:$0xff]  }
 0x133   :  { %1385 = vmatprep.subr.bf16.mxu1 %v2196_v0 }
 0x135   :  { %1646 = vmatpush1.bf16.msra.mxu0 %v2647_v3  ;;  %v2198_v3 = vld [vmem:[#allocation8 + $0x1c0] ss:$16 sps:$4 sm:$0xff]  }
 0x136   :  { %1647 = vmatprep.subr.bf16.mxu0 %v2650_v4  ;;  %1386 = vmatpush1.bf16.msra.mxu1 %v2198_v3  ;;  %v2199_v4 = vld [vmem:[#allocation8 + $0x1e4] ss:$16 sps:$4 sm:$0xff]  }
 0x137   :  { %1387 = vmatprep.subr.bf16.mxu1 %v2199_v4 }
 0x139   :  { %1648 = vmatpush1.bf16.msra.mxu0 %v2659_v7  ;;  %v2201_v7 = vld [vmem:[#allocation8 + $0x1e0] ss:$16 sps:$4 sm:$0xff]  }
 0x13a   :  { %1649 = vmatprep.subr.bf16.mxu0 %v2662_v8  ;;  %1388 = vmatpush1.bf16.msra.mxu1 %v2201_v7  ;;  %v2204_v8 = vld [vmem:[#allocation8 + $0xc] ss:$16 sps:$4 sm:$0xff]  }
 0x13b   :  { %1398 = vmatprep.subr.bf16.mxu1 %v2204_v8 }
 0x13d   :  { %1650 = vmatpush1.bf16.msra.mxu0 %v2671_v11  ;;  %v2911_v11 = vshrl.u32 %v278_v9, 7  ;;  %v2957_v9 = vld [vmem:[#allocation8 + $0xac] ss:$16 sps:$4 sm:$0xff]  }
 0x13e   :  { %1651 = vmatprep.subr.bf16.mxu0 %v2674_v12 }
 0x13f   :  { %v3258_v12 = vsub.s32 0, %v2911_v11 }
 0x141   :  { %1652 = vmatpush1.bf16.msra.mxu0 %v2683_v15  ;;  %v255_v15 = vld [vmem:[%s3203_s3] sm:$0x3] }
 0x142   :  { %1653 = vmatprep.subr.bf16.mxu0 %v2686_v16  ;;  %v3257_v16 = vsub.s32 1, %v2911_v11  ;;  %v2920_v17 = vrot.slane %v255_v15, %v3258_v12  ;;  %v2993_v12 = vld [vmem:[#allocation8 + $0x16c] ss:$16 sps:$4 sm:$0xff]  }
 0x143   :  { %3338 = vst [vmem:[#allocation77_spill] sm:$0xff] %v2993_v12 }
 0x145   :  { %1654 = vmatpush1.bf16.msra.mxu0 %v2697_v20  ;;  %v2924_v20 = vrot.slane %v255_v15, %v3257_v16  ;;  %v2960_v15 = vld [vmem:[#allocation8 + $0xa8] ss:$16 sps:$4 sm:$0xff]  }
 0x146   :  { %1655 = vmatprep.subr.bf16.mxu0 %v2700_v21  ;;  %3327 = vst [vmem:[#allocation66_spill] sm:$0xff] %v2960_v15  ;;  %v2990_v16 = vld [vmem:[#allocation8 + $0x148] ss:$16 sps:$4 sm:$0xff]  }
 0x147   :  { %3337 = vst [vmem:[#allocation76_spill] sm:$0xff] %v2990_v16 }
 0x149   :  { %1656 = vmatpush1.bf16.msra.mxu0 %v2711_v25 }
 0x14a   :  { %1657 = vmatprep.subr.bf16.mxu0 %v2716_v27 }
 0x14d   :  { %1658 = vmatpush1.bf16.msra.mxu0 %v2725_v40 }
 0x14e   :  { %1659 = vmatprep.subr.bf16.mxu0 %v2728_v34 }
 0x151   :  { %1660 = vmatpush1.bf16.msra.mxu0 %v2737_v24 }
 0x152   :  { %1661 = vmatprep.subr.bf16.mxu0 %v2740_v26 }
 0x155   :  { %1662 = vmatpush1.bf16.msra.mxu0 %v2749_v36  ;;  %v2928_v36 = vld [vmem:[#allocation8 + $0x8] ss:$16 sps:$4 sm:$0xff]  }
 0x156   :  { %1663 = vmatprep.subr.bf16.mxu0 %v2752_v38 }
 0x159   :  { %1664 = vmatpush1.bf16.msra.mxu0 %v2761_v23 }
 0x15a   :  { %1665 = vmatprep.subr.bf16.mxu0 %v2190_v58 }
 0x15d   :  { %1666 = vmatpush1.bf16.msra.mxu0 %v2192_v59  ;;  %v2932_v59 = vld [vmem:[#allocation8 + $0x2c] ss:$16 sps:$4 sm:$0xff]  }
 0x15e   :  { %1667 = vmatprep.subr.bf16.mxu0 %v2193_v60  ;;  %v2936_v60 = vld [vmem:[#allocation8 + $0x28] ss:$16 sps:$4 sm:$0xff]  }
 0x161   :  { %1668 = vmatpush1.bf16.msra.mxu0 %v2195_v63  ;;  %v2939_v63 = vld [vmem:[#allocation8 + $0x4c] ss:$16 sps:$4 sm:$0xff]  }
 0x162   :  { %1669 = vmatprep.subr.bf16.mxu0 %v2196_v0  ;;  %v2942_v0 = vld [vmem:[#allocation8 + $0x48] ss:$16 sps:$4 sm:$0xff]  }
 0x165   :  { %1670 = vmatpush1.bf16.msra.mxu0 %v2198_v3  ;;  %v2945_v3 = vld [vmem:[#allocation8 + $0x6c] ss:$16 sps:$4 sm:$0xff]  }
 0x166   :  { %1671 = vmatprep.subr.bf16.mxu0 %v2199_v4  ;;  %v2948_v4 = vld [vmem:[#allocation8 + $0x68] ss:$16 sps:$4 sm:$0xff]  }
 0x169   :  { %1672 = vmatpush1.bf16.msra.mxu0 %v2201_v7  ;;  %v2951_v7 = vld [vmem:[#allocation8 + $0x8c] ss:$16 sps:$4 sm:$0xff]  }
 0x16a   :  { %1682 = vmatprep.subr.bf16.mxu0 %v2204_v8  ;;  %v2954_v8 = vld [vmem:[#allocation8 + $0x88] ss:$16 sps:$4 sm:$0xff]  }
 0x1ff   :  { %v1005_v21 = vpop.f32.mrb[0].mxu0 }
 0x200   :  { %v1944_v24 = vadd.f32 %v1005_v21, %v2920_v17  ;;  %v1007_v25 = vpop.f32.mrb[1].mxu0  ;;  %v2963_v21 = vld [vmem:[#allocation8 + $0xcc] ss:$16 sps:$4 sm:$0xff]  }
 0x201   :  { %v1945_v27 = vadd.f32 %v1007_v25, %v2924_v20  ;;  %v1009_v38 = vpop.f32.mrb[2].mxu0  ;;  %3328 = vst [vmem:[#allocation67_spill] sm:$0xff] %v2963_v21  ;;  %v2969_v25 = vld [vmem:[#allocation8 + $0xec] ss:$16 sps:$4 sm:$0xff]  }
 0x202   :  { %2253 = vtanh.f32 %v1944_v24  ;;  %v1010_v40 = vpop.f32.mrb[3].mxu0  ;;  %v2966_v24 = vld [vmem:[#allocation8 + $0xc8] ss:$16 sps:$4 sm:$0xff]   ;;  %3330 = vst [vmem:[#allocation69_spill] sm:$0xff] %v2969_v25  ;;  %v2975_v38 = vld [vmem:[#allocation8 + $0x10c] ss:$16 sps:$4 sm:$0xff]  }
 0x203   :  { %2255 = vtanh.f32 %v1945_v27  ;;  %3329 = vst [vmem:[#allocation68_spill] sm:$0xff] %v2966_v24  ;;  %v2972_v27 = vld [vmem:[#allocation8 + $0xe8] ss:$16 sps:$4 sm:$0xff]   ;;  %3332 = vst [vmem:[#allocation71_spill] sm:$0xff] %v2975_v38 }
 0x204   :  { %3331 = vst [vmem:[#allocation70_spill] sm:$0xff] %v2972_v27  ;;  %v2978_v40 = vld [vmem:[#allocation8 + $0x108] ss:$16 sps:$4 sm:$0xff]  }
 0x205   :  { %3333 = vst [vmem:[#allocation72_spill] sm:$0xff] %v2978_v40 }
 0x20c   :  { %v2254_v34 = vpop.eup %2253 }
 0x20d   :  { %v2256_v23 = vpop.eup %2255  ;;  %v2930_v58 = vpack.c.bf16 %v2254_v34, %v2254_v34  ;;  %v2981_v34 = vld [vmem:[#allocation8 + $0x12c] ss:$16 sps:$4 sm:$0xff]  }
 0x20e   :  { %v1015_v26 = vpack.c.bf16 %v2256_v23, %v2256_v23  ;;  %3334 = vst [vmem:[#allocation73_spill] sm:$0xff] %v2981_v34  ;;  %v2984_v23 = vld [vmem:[#allocation8 + $0x128] ss:$16 sps:$4 sm:$0xff]  }
 0x20f   :  { %3335 = vst [vmem:[#allocation74_spill] sm:$0xff] %v2984_v23 }
 0x210   :  { %1389 = vmatprep.mubr.bf16.mxu1 %v1015_v26 }
 0x211   :  { %1390 = vmatmul.mubr.bf16.vlgmr.msra.gmra.mrb[0].mxu1 %v2930_v58 }
 0x212   :  { %1399 = vmatpush1.bf16.msra.mxu1 %v2928_v36  ;;  %1430 = vmatprep.mubr.bf16.mxu1 %v1015_v26  ;;  %v2987_v26 = vld [vmem:[#allocation8 + $0x14c] ss:$16 sps:$4 sm:$0xff]  }
 0x213   :  { %1400 = vmatprep.subr.bf16.mxu1 %v2932_v59  ;;  %3336 = vst [vmem:[#allocation75_spill] sm:$0xff] %v2987_v26 }
 0x216   :  { %1401 = vmatpush1.bf16.msra.mxu1 %v2936_v60 }
 0x217   :  { %1402 = vmatprep.subr.bf16.mxu1 %v2939_v63 }
 0x21a   :  { %1403 = vmatpush1.bf16.msra.mxu1 %v2942_v0 }
 0x21b   :  { %1404 = vmatprep.subr.bf16.mxu1 %v2945_v3 }
 0x21e   :  { %1405 = vmatpush1.bf16.msra.mxu1 %v2948_v4 }
 0x21f   :  { %1406 = vmatprep.subr.bf16.mxu1 %v2951_v7 }
 0x222   :  { %1407 = vmatpush1.bf16.msra.mxu1 %v2954_v8 }
 0x223   :  { %1408 = vmatprep.subr.bf16.mxu1 %v2957_v9 }
 0x226   :  { %1409 = vmatpush1.bf16.msra.mxu1 %v2960_v15  ;;  %v2283_v15 = vld [vmem:[#allocation7 + $0x34] ss:$8 sps:$4 sm:$0xff]  }
 0x227   :  { %1410 = vmatprep.subr.bf16.mxu1 %v2963_v21  ;;  %v2282_v21 = vld [vmem:[#allocation7 + $0x20] ss:$8 sps:$4 sm:$0xff]  }
 0x22a   :  { %1411 = vmatpush1.bf16.msra.mxu1 %v2966_v24  ;;  %v2281_v24 = vld [vmem:[#allocation7 + $0x24] ss:$8 sps:$4 sm:$0xff]  }
 0x22b   :  { %1412 = vmatprep.subr.bf16.mxu1 %v2969_v25  ;;  %v2279_v25 = vld [vmem:[#allocation7 + $0x14] ss:$8 sps:$4 sm:$0xff]  }
 0x22e   :  { %1413 = vmatpush1.bf16.msra.mxu1 %v2972_v27  ;;  %v3019_v27 = vld [vmem:[#allocation5] sm:$0xff] }
 0x22f   :  { %1414 = vmatprep.subr.bf16.mxu1 %v2975_v38  ;;  %v2996_v38 = vld [vmem:[#allocation8 + $0x168] ss:$16 sps:$4 sm:$0xff]  }
 0x230   :  { %3339 = vst [vmem:[#allocation78_spill] sm:$0xff] %v2996_v38 }
 0x232   :  { %1415 = vmatpush1.bf16.msra.mxu1 %v2978_v40  ;;  %v2999_v40 = vld [vmem:[#allocation8 + $0x18c] ss:$16 sps:$4 sm:$0xff]  }
 0x233   :  { %1416 = vmatprep.subr.bf16.mxu1 %v2981_v34  ;;  %3340 = vst [vmem:[#allocation79_spill] sm:$0xff] %v2999_v40  ;;  %v3002_v34 = vld [vmem:[#allocation8 + $0x188] ss:$16 sps:$4 sm:$0xff]  }
 0x234   :  { %3341 = vst [vmem:[#allocation80_spill] sm:$0xff] %v3002_v34 }
 0x236   :  { %1417 = vmatpush1.bf16.msra.mxu1 %v2984_v23  ;;  %v3005_v23 = vld [vmem:[#allocation8 + $0x1ac] ss:$16 sps:$4 sm:$0xff]  }
 0x237   :  { %1418 = vmatprep.subr.bf16.mxu1 %v2987_v26  ;;  %3342 = vst [vmem:[#allocation81_spill] sm:$0xff] %v3005_v23  ;;  %v3008_v26 = vld [vmem:[#allocation8 + $0x1a8] ss:$16 sps:$4 sm:$0xff]  }
 0x238   :  { %3343 = vst [vmem:[#allocation82_spill] sm:$0xff] %v3008_v26 }
 0x23a   :  { %1419 = vmatpush1.bf16.msra.mxu1 %v2990_v16  ;;  %v3011_v16 = vld [vmem:[#allocation8 + $0x1cc] ss:$16 sps:$4 sm:$0xff]  }
 0x23b   :  { %1420 = vmatprep.subr.bf16.mxu1 %v2993_v12  ;;  %3344 = vst [vmem:[#allocation83_spill] sm:$0xff] %v3011_v16  ;;  %v3014_v12 = vld [vmem:[#allocation8 + $0x1c8] ss:$16 sps:$4 sm:$0xff]  }
 0x23c   :  { %3345 = vst [vmem:[#allocation84_spill] sm:$0xff] %v3014_v12 }
 0x23e   :  { %1421 = vmatpush1.bf16.msra.mxu1 %v2996_v38  ;;  %v3017_v38 = vld [vmem:[#allocation8 + $0x1ec] ss:$16 sps:$4 sm:$0xff]  }
 0x23f   :  { %1422 = vmatprep.subr.bf16.mxu1 %v2999_v40  ;;  %3346 = vst [vmem:[#allocation85_spill] sm:$0xff] %v3017_v38  ;;  %v3022_v40 = vld [vmem:[#allocation8 + $0x1e8] ss:$16 sps:$4 sm:$0xff]  }
 0x242   :  { %1423 = vmatpush1.bf16.msra.mxu1 %v3002_v34  ;;  %v1460_v34 = vcombine.high %v3019_v27, %v3019_v27 }
 0x243   :  { %1424 = vmatprep.subr.bf16.mxu1 %v3005_v23  ;;  %v2277_v23 = vld [vmem:[#allocation7 + $0x4] ss:$8 sps:$4 sm:$0xff]  }
 0x246   :  { %1425 = vmatpush1.bf16.msra.mxu1 %v3008_v26  ;;  %v1467_v26 = vpack.c.bf16 %v1460_v34, %v1460_v34  ;;  %v2285_v34 = vld [vmem:[#allocation7 + $0x44] ss:$8 sps:$4 sm:$0xff]  }
 0x247   :  { %1426 = vmatprep.subr.bf16.mxu1 %v3011_v16  ;;  %v2278_v16 = vld [vmem:[#allocation7] ss:$8 sps:$4 sm:$0xff]  }
 0x24a   :  { %1427 = vmatpush1.bf16.msra.mxu1 %v3014_v12  ;;  %v2280_v12 = vld [vmem:[#allocation7 + $0x10] ss:$8 sps:$4 sm:$0xff]  }
 0x24b   :  { %1428 = vmatprep.subr.bf16.mxu1 %v3017_v38  ;;  %v2284_v38 = vld [vmem:[#allocation7 + $0x30] ss:$8 sps:$4 sm:$0xff]  }
 0x24e   :  { %1429 = vmatpush1.bf16.msra.mxu1 %v3022_v40 }
 0x24f   :  { %1473 = vmatprep.subr.bf16.mxu1 %v2277_v23  ;;  %v2286_v23 = vld [vmem:[#allocation7 + $0x40] ss:$8 sps:$4 sm:$0xff]  }
 0x251   :  { %1431 = vmatmul.mubr.bf16.vlgmr.msra.gmra.mrb[4].mxu1 %v2930_v58  ;;  %v2287_v58 = vld [vmem:[#allocation7 + $0x54] ss:$8 sps:$4 sm:$0xff]  }
 0x252   :  { %1474 = vmatpush1.bf16.msra.mxu1 %v2278_v16  ;;  %1505 = vmatprep.mubr.bf16.mxu1 %v1467_v26  ;;  %v2288_v16 = vld [vmem:[#allocation7 + $0x50] ss:$8 sps:$4 sm:$0xff]   ;;  %v2289_v26 = vld [vmem:[#allocation7 + $0x64] ss:$8 sps:$4 sm:$0xff]  }
 0x253   :  { %1475 = vmatprep.subr.bf16.mxu1 %v2279_v25  ;;  %v2290_v25 = vld [vmem:[#allocation7 + $0x60] ss:$8 sps:$4 sm:$0xff]  }
 0x256   :  { %1476 = vmatpush1.bf16.msra.mxu1 %v2280_v12  ;;  %v2291_v12 = vld [vmem:[#allocation7 + $0x74] ss:$8 sps:$4 sm:$0xff]  }
 0x257   :  { %1477 = vmatprep.subr.bf16.mxu1 %v2281_v24  ;;  %v2292_v24 = vld [vmem:[#allocation7 + $0x70] ss:$8 sps:$4 sm:$0xff]  }
 0x25a   :  { %1478 = vmatpush1.bf16.msra.mxu1 %v2282_v21  ;;  %v2293_v21 = vld [vmem:[#allocation7 + $0x84] ss:$8 sps:$4 sm:$0xff]  }
 0x25b   :  { %1479 = vmatprep.subr.bf16.mxu1 %v2283_v15  ;;  %v2294_v15 = vld [vmem:[#allocation7 + $0x80] ss:$8 sps:$4 sm:$0xff]  }
 0x25e   :  { %1480 = vmatpush1.bf16.msra.mxu1 %v2284_v38  ;;  %v2295_v38 = vld [vmem:[#allocation7 + $0x94] ss:$8 sps:$4 sm:$0xff]  }
 0x25f   :  { %1481 = vmatprep.subr.bf16.mxu1 %v2285_v34  ;;  %v2296_v34 = vld [vmem:[#allocation7 + $0x90] ss:$8 sps:$4 sm:$0xff]  }
 0x262   :  { %1482 = vmatpush1.bf16.msra.mxu1 %v2286_v23  ;;  %v2297_v23 = vld [vmem:[#allocation7 + $0xa4] ss:$8 sps:$4 sm:$0xff]  }
 0x263   :  { %1483 = vmatprep.subr.bf16.mxu1 %v2287_v58  ;;  %v2298_v58 = vld [vmem:[#allocation7 + $0xa0] ss:$8 sps:$4 sm:$0xff]  }
 0x266   :  { %1484 = vmatpush1.bf16.msra.mxu1 %v2288_v16  ;;  %v2299_v16 = vld [vmem:[#allocation7 + $0xb4] ss:$8 sps:$4 sm:$0xff]  }
 0x267   :  { %1485 = vmatprep.subr.bf16.mxu1 %v2289_v26  ;;  %v2300_v26 = vld [vmem:[#allocation7 + $0xb0] ss:$8 sps:$4 sm:$0xff]  }
 0x26a   :  { %1486 = vmatpush1.bf16.msra.mxu1 %v2290_v25  ;;  %v2301_v25 = vld [vmem:[#allocation7 + $0xc4] ss:$8 sps:$4 sm:$0xff]  }
 0x26b   :  { %1487 = vmatprep.subr.bf16.mxu1 %v2291_v12  ;;  %v2302_v12 = vld [vmem:[#allocation7 + $0xc0] ss:$8 sps:$4 sm:$0xff]  }
 0x26e   :  { %1488 = vmatpush1.bf16.msra.mxu1 %v2292_v24  ;;  %v1454_v24 = vld [vmem:[#allocation5 + $0x8] sm:$0xff] }
 0x26f   :  { %1489 = vmatprep.subr.bf16.mxu1 %v2293_v21  ;;  %v1461_v21 = vcombine.high %v1454_v24, %v1454_v24 }
 0x272   :  { %1490 = vmatpush1.bf16.msra.mxu1 %v2294_v15  ;;  %v1466_v15 = vpack.c.bf16 %v3019_v27, %v3019_v27  ;;  %v3367_v27 = vld [vmem:[#allocation36_spill] sm:$0xff] }
 0x273   :  { %1491 = vmatprep.subr.bf16.mxu1 %v2295_v38  ;;  %v1469_v38 = vpack.c.bf16 %v1461_v21, %v1461_v21 }
 0x276   :  { %1492 = vmatpush1.bf16.msra.mxu1 %v2296_v34 }
 0x277   :  { %1493 = vmatprep.subr.bf16.mxu1 %v2297_v23 }
 0x27a   :  { %1494 = vmatpush1.bf16.msra.mxu1 %v2298_v58  ;;  %v3368_v58 = vld [vmem:[#allocation37_spill] sm:$0xff] }
 0x27b   :  { %1495 = vmatprep.subr.bf16.mxu1 %v2299_v16  ;;  %v3369_v16 = vld [vmem:[#allocation38_spill] sm:$0xff] }
 0x27e   :  { %1496 = vmatpush1.bf16.msra.mxu1 %v2300_v26  ;;  %v3370_v26 = vld [vmem:[#allocation39_spill] sm:$0xff] }
 0x27f   :  { %1497 = vmatprep.subr.bf16.mxu1 %v2301_v25  ;;  %v3371_v25 = vld [vmem:[#allocation40_spill] sm:$0xff] }
 0x282   :  { %1498 = vmatpush1.bf16.msra.mxu1 %v2302_v12  ;;  %v3372_v12 = vld [vmem:[#allocation41_spill] sm:$0xff] }
 0x283   :  { %1499 = vmatprep.subr.bf16.mxu1 %v2544_v29  ;;  %v3347_v29 = vld [vmem:[#allocation18_spill] sm:$0xff] }
 0x286   :  { %1500 = vmatpush1.bf16.msra.mxu1 %v2546_v30  ;;  %v3348_v30 = vld [vmem:[#allocation19_spill] sm:$0xff] }
 0x287   :  { %1501 = vmatprep.subr.bf16.mxu1 %v2549_v31  ;;  %v3349_v31 = vld [vmem:[#allocation20_spill] sm:$0xff] }
 0x28a   :  { %1502 = vmatpush1.bf16.msra.mxu1 %v2552_v32  ;;  %v3350_v32 = vld [vmem:[#allocation21_spill] sm:$0xff] }
 0x28b   :  { %1503 = vmatprep.subr.bf16.mxu1 %v2555_v33  ;;  %v1455_v33 = vld [vmem:[#allocation5 + $0x10] sm:$0xff] }
 0x28e   :  { %1504 = vmatpush1.bf16.msra.mxu1 %v2560_v35  ;;  %v3351_v35 = vld [vmem:[#allocation22_spill] sm:$0xff] }
 0x28f   :  { %1514 = vmatprep.subr.bf16.mxu1 %v2565_v37  ;;  %v1462_v37 = vcombine.high %v1455_v33, %v1455_v33 }
 0x291   :  { %1506 = vmatmul.mubr.bf16.vlgmr.msra.gmra.mrb[8].mxu1 %v1466_v15  ;;  %v3373_v15 = vld [vmem:[#allocation42_spill] sm:$0xff] }
 0x292   :  { %1515 = vmatpush1.bf16.msra.mxu1 %v2568_v39  ;;  %1546 = vmatprep.mubr.bf16.mxu1 %v1469_v38  ;;  %v3352_v39 = vld [vmem:[#allocation23_spill] sm:$0xff] }
 0x293   :  { %1516 = vmatprep.subr.bf16.mxu1 %v2571_v41  ;;  %v1468_v41 = vpack.c.bf16 %v1454_v24, %v1454_v24  ;;  %v3374_v38 = vld [vmem:[#allocation43_spill] sm:$0xff] }
 0x296   :  { %1517 = vmatpush1.bf16.msra.mxu1 %v2574_v42  ;;  %v3353_v42 = vld [vmem:[#allocation24_spill] sm:$0xff] }
 0x297   :  { %1518 = vmatprep.subr.bf16.mxu1 %v2576_v43  ;;  %v1471_v43 = vpack.c.bf16 %v1462_v37, %v1462_v37  ;;  %v3379_v37 = vld [vmem:[#allocation48_spill] sm:$0xff] }
 0x29a   :  { %1519 = vmatpush1.bf16.msra.mxu1 %v2580_v44  ;;  %v3354_v44 = vld [vmem:[#allocation25_spill] sm:$0xff] }
 0x29b   :  { %1520 = vmatprep.subr.bf16.mxu1 %v2582_v45  ;;  %v3355_v45 = vld [vmem:[#allocation26_spill] sm:$0xff] }
 0x29e   :  { %1521 = vmatpush1.bf16.msra.mxu1 %v2586_v46  ;;  %v3356_v46 = vld [vmem:[#allocation27_spill] sm:$0xff] }
 0x29f   :  { %1522 = vmatprep.subr.bf16.mxu1 %v2588_v47  ;;  %v3357_v47 = vld [vmem:[#allocation28_spill] sm:$0xff] }
 0x2a2   :  { %1523 = vmatpush1.bf16.msra.mxu1 %v2592_v48  ;;  %v3358_v48 = vld [vmem:[#allocation29_spill] sm:$0xff] }
 0x2a3   :  { %1524 = vmatprep.subr.bf16.mxu1 %v2594_v49  ;;  %v3359_v49 = vld [vmem:[#allocation30_spill] sm:$0xff] }
 0x2a6   :  { %1525 = vmatpush1.bf16.msra.mxu1 %v2598_v50  ;;  %v3360_v50 = vld [vmem:[#allocation31_spill] sm:$0xff] }
 0x2a7   :  { %1526 = vmatprep.subr.bf16.mxu1 %v2600_v51  ;;  %v3361_v51 = vld [vmem:[#allocation32_spill] sm:$0xff] }
 0x2aa   :  { %1527 = vmatpush1.bf16.msra.mxu1 %v2604_v52  ;;  %v256_v52 = vld [vmem:[%s3205_s5] sm:$0xf]  ;;  %s2454_s5 = smov [#allocation10]  }
 0x2ab   :  { %1528 = vmatprep.subr.bf16.mxu1 %v2606_v53  ;;  %v3362_v53 = vld [vmem:[#allocation33_spill] sm:$0xff]  ;;  %s1743_s29 = sshll.u32 %s2454_s5, 4  ;;  %s1744_s29 = int_to_ptr.vmem [resolvable:$true] %s1743_s29 }
 0x2ac   :  { %s2391_s30 = scalar_lea.vmem %s1744_s29, 256  ;;  %p2396_p5 = scmp.lt.s32.totalorder %s1744_s29, %s1744_s29 }
 0x2ad   :  { %p2392_p4 = scmp.ne.s32.totalorder %s1744_s29, %s2391_s30  ;;  %p2397_p6 = scmp.lt.s32.totalorder %s2391_s30, %s2391_s30 }
 0x2ae   :  { %1529 = vmatpush1.bf16.msra.mxu1 %v2610_v54  ;;  %v3363_v54 = vsub.s32 0, %v2911_v11 }
 0x2af   :  { %1530 = vmatprep.subr.bf16.mxu1 %v2612_v55  ;;  %p2398_p7 = por %p2397_p6, %p2396_p5 }
 0x2b0   :  { %v3083_v55 = vrot.slane %v256_v52, %v3363_v54  ;;  %v3392_v54 = vld [vmem:[#allocation60_spill] sm:$0xff] }
 0x2b1   :  { %p2399_p8 = pnand %p2398_p7, %p2392_p4 }
 0x2b2   :  { %1531 = vmatpush1.bf16.msra.mxu1 %v2615_v56  ;;  %v3364_v56 = vld [vmem:[#allocation34_spill] sm:$0xff] }
 0x2b3   :  { %1532 = vmatprep.subr.bf16.mxu1 %v2618_v57  ;;  %v3365_v57 = vsub.s32 1, %v2911_v11 }
 0x2b6   :  { %1533 = vmatpush1.bf16.msra.mxu1 %v2628_v61  ;;  %v3088_v61 = vrot.slane %v256_v52, %v3365_v57  ;;  %v3394_v57 = vld [vmem:[#allocation62_spill] sm:$0xff] }
 0x2b7   :  { %1534 = vmatprep.subr.bf16.mxu1 %v2631_v62  ;;  %v3366_v62 = vld [vmem:[#allocation35_spill] sm:$0xff] }
 0x2ba   :  { %1535 = vmatpush1.bf16.msra.mxu1 %v2641_v1 }
 0x2bb   :  { %1536 = vmatprep.subr.bf16.mxu1 %v2644_v2 }
 0x2be   :  { %1537 = vmatpush1.bf16.msra.mxu1 %v2653_v5 }
 0x2bf   :  { %1538 = vmatprep.subr.bf16.mxu1 %v2656_v6 }
 0x2c2   :  { %1539 = vmatpush1.bf16.msra.mxu1 %v3347_v29 }
 0x2c3   :  { %1540 = vmatprep.subr.bf16.mxu1 %v3348_v30  ;;  %v3375_v30 = vld [vmem:[#allocation44_spill] sm:$0xff] }
 0x2c6   :  { %1541 = vmatpush1.bf16.msra.mxu1 %v3349_v31  ;;  %v3376_v31 = vld [vmem:[#allocation45_spill] sm:$0xff] }
 0x2c7   :  { %1542 = vmatprep.subr.bf16.mxu1 %v3350_v32  ;;  %v3377_v32 = vld [vmem:[#allocation46_spill] sm:$0xff] }
 0x2ca   :  { %1543 = vmatpush1.bf16.msra.mxu1 %v3351_v35  ;;  %v3378_v35 = vld [vmem:[#allocation47_spill] sm:$0xff] }
 0x2cb   :  { %1544 = vmatprep.subr.bf16.mxu1 %v3352_v39  ;;  %v3380_v39 = vld [vmem:[#allocation49_spill] sm:$0xff] }
 0x2ce   :  { %1545 = vmatpush1.bf16.msra.mxu1 %v3353_v42  ;;  %v3382_v42 = vld [vmem:[#allocation51_spill] sm:$0xff] }
 0x2cf   :  { %1555 = vmatprep.subr.bf16.mxu1 %v3354_v44  ;;  %v3384_v44 = vld [vmem:[#allocation53_spill] sm:$0xff] }
 0x2d1   :  { %1547 = vmatmul.mubr.bf16.vlgmr.msra.gmra.mrb[8].mxu1 %v1468_v41  ;;  %v3381_v41 = vld [vmem:[#allocation50_spill] sm:$0xff] }
 0x2d2   :  { %1556 = vmatpush1.bf16.msra.mxu1 %v3355_v45  ;;  %1587 = vmatprep.mubr.bf16.mxu1 %v1471_v43  ;;  %v3383_v43 = vld [vmem:[#allocation52_spill] sm:$0xff]  ;;  %v3385_v45 = vld [vmem:[#allocation54_spill] sm:$0xff] }
 0x2d3   :  { %1557 = vmatprep.subr.bf16.mxu1 %v3356_v46  ;;  %v3386_v46 = vld [vmem:[#allocation55_spill] sm:$0xff] }
 0x2d6   :  { %1558 = vmatpush1.bf16.msra.mxu1 %v3357_v47  ;;  %v1470_v47 = vpack.c.bf16 %v1455_v33, %v1455_v33  ;;  %v1027_v33 = vsub.s32 2, %v2911_v11 }
 0x2d7   :  { %1559 = vmatprep.subr.bf16.mxu1 %v3358_v48  ;;  %v3387_v48 = vld [vmem:[#allocation56_spill] sm:$0xff] }
 0x2da   :  { %1560 = vmatpush1.bf16.msra.mxu1 %v3359_v49  ;;  %v3388_v49 = vld [vmem:[#allocation57_spill] sm:$0xff] }
 0x2db   :  { %1561 = vmatprep.subr.bf16.mxu1 %v3360_v50  ;;  %v3389_v50 = vmov 0  }
 0x2de   :  { %1562 = vmatpush1.bf16.msra.mxu1 %v3361_v51  ;;  %v3390_v51 = vld [vmem:[#allocation58_spill] sm:$0xff] }
 0x2df   :  { %1563 = vmatprep.subr.bf16.mxu1 %v3362_v53  ;;  %v3391_v53 = vld [vmem:[#allocation59_spill] sm:$0xff] }
 0x2e2   :  { %1564 = vmatpush1.bf16.msra.mxu1 %v3364_v56  ;;  %v3393_v56 = vld [vmem:[#allocation61_spill] sm:$0xff] }
 0x2e3   :  { %1565 = vmatprep.subr.bf16.mxu1 %v3366_v62  ;;  %v1031_v62 = vsub.s32 3, %v2911_v11 }
 0x2e4   :  { %v1391_v1 = vpop.f32.mrb[0].mxu1 }
 0x2e5   :  { %v1392_v2 = vadd.f32 %v1391_v1, %v3083_v55  ;;  %v1393_v5 = vpop.f32.mrb[1].mxu1  ;;  %v3396_v1 = vld [vmem:[#allocation64_spill] sm:$0xff] }
 0x2e6   :  { %v1394_v6 = vadd.f32 %v1393_v5, %v3088_v61  ;;  %1566 = vmatpush1.bf16.msra.mxu1 %v3367_v27  ;;  %v1395_v34 = vpop.f32.mrb[2].mxu1  ;;  %v3397_v5 = vld [vmem:[#allocation65_spill] sm:$0xff] }
 0x2e7   :  { %2257 = vtanh.f32 %v1392_v2  ;;  %v1396_v23 = vpop.f32.mrb[3].mxu1  ;;  %1567 = vmatprep.subr.bf16.mxu1 %v3368_v58  ;;  %v3126_v2 = vrot.slane %v256_v52, %v1027_v33 }
 0x2e8   :  { %2259 = vtanh.f32 %v1394_v6  ;;  %v3129_v6 = vrot.slane %v256_v52, %v1031_v62  ;;  %v1456_v52 = vld [vmem:[#allocation5 + $0x18] sm:$0xf] }
 0x2ea   :  { %1568 = vmatpush1.bf16.msra.mxu1 %v3369_v16 }
 0x2eb   :  { %1569 = vmatprep.subr.bf16.mxu1 %v3370_v26 }
 0x2ee   :  { %1570 = vmatpush1.bf16.msra.mxu1 %v3371_v25 }
 0x2ef   :  { %1571 = vmatprep.subr.bf16.mxu1 %v3372_v12 }
 0x2f1   :  { %v2258_v24 = vpop.eup %2257 }
 0x2f2   :  { %v2260_v21 = vpop.eup %2259  ;;  %1572 = vmatpush1.bf16.msra.mxu1 %v3373_v15 }
 0x2f3   :  { %1573 = vmatprep.subr.bf16.mxu1 %v3374_v38  ;;  %v1447_v29 = vcombine.low %v2258_v24, %v2260_v21 }
 0x2f5   :  { %1451 = vst [vmem:[#allocation10] sm:$0xff] %v1447_v29 }
 0x2f6   :  { %1574 = vmatpush1.bf16.msra.mxu1 %v3375_v30 }
 0x2f7   :  { %1575 = vmatprep.subr.bf16.mxu1 %v3376_v31  ;;  %v3411_v31 = vld [vmem:[#allocation79_spill] sm:$0xff] }
 0x2fa   :  { %1576 = vmatpush1.bf16.msra.mxu1 %v3377_v32  ;;  %v3412_v32 = vld [vmem:[#allocation80_spill] sm:$0xff] }
 0x2fb   :  { %1577 = vmatprep.subr.bf16.mxu1 %v3378_v35  ;;  %v3413_v35 = vld [vmem:[#allocation81_spill] sm:$0xff] }
 0x2fe   :  { %1578 = vmatpush1.bf16.msra.mxu1 %v3379_v37  ;;  %v3414_v37 = vld [vmem:[#allocation82_spill] sm:$0xff] }
 0x2ff   :  { %1579 = vmatprep.subr.bf16.mxu1 %v3380_v39  ;;  %v3415_v39 = vld [vmem:[#allocation83_spill] sm:$0xff] }
 0x302   :  { %1580 = vmatpush1.bf16.msra.mxu1 %v3381_v41  ;;  %v3416_v41 = vld [vmem:[#allocation84_spill] sm:$0xff] }
 0x303   :  { %1581 = vmatprep.subr.bf16.mxu1 %v3382_v42  ;;  %v3417_v42 = vld [vmem:[#allocation85_spill] sm:$0xff] }
 0x306   :  { %1582 = vmatpush1.bf16.msra.mxu1 %v3383_v43 }
 0x307   :  { %1583 = vmatprep.subr.bf16.mxu1 %v3384_v44 }
 0x30a   :  { %1584 = vmatpush1.bf16.msra.mxu1 %v3385_v45 }
 0x30b   :  { %1585 = vmatprep.subr.bf16.mxu1 %v3386_v46 }
 0x30e   :  { %1586 = vmatpush1.bf16.msra.mxu1 %v2832_v13  ;;  %v3395_v13 = vld [vmem:[#allocation63_spill] sm:$0xff] }
 0x30f   :  { %1596 = vmatprep.subr.bf16.mxu1 %v3387_v48 }
 0x311   :  { %1588 = vmatmul.mubr.bf16.vlgmr.msra.gmra.mrb[8].mxu1 %v1470_v47 }
 0x312   :  { %1597 = vmatpush1.bf16.msra.mxu1 %v3388_v49  ;;  %1628 = vmatprep.mubr.bf16.mxu1 %v3389_v50 }
 0x313   :  { %1598 = vmatprep.subr.bf16.mxu1 %v3390_v51 }
 0x316   :  { %1599 = vmatpush1.bf16.msra.mxu1 %v3391_v53 }
 0x317   :  { %1600 = vmatprep.subr.bf16.mxu1 %v3392_v54 }
 0x31a   :  { %1601 = vmatpush1.bf16.msra.mxu1 %v3393_v56 }
 0x31b   :  { %1602 = vmatprep.subr.bf16.mxu1 %v3394_v57 }
 0x31e   :  { %1603 = vmatpush1.bf16.msra.mxu1 %v3395_v13 }
 0x31f   :  { %1604 = vmatprep.subr.bf16.mxu1 %v3396_v1 }
 0x322   :  { %1605 = vmatpush1.bf16.msra.mxu1 %v3397_v5 }
 0x323   :  { %1606 = vmatprep.subr.bf16.mxu1 %v2868_v18  ;;  %v1472_v18 = vpack.c.bf16 %v1456_v52, %v1456_v52 }
 0x324   :  { %v1432_v27 = vpop.f32.mrb[4].mxu1 }
 0x325   :  { %v1433_v34 = vadd.f32 %v1432_v27, %v3126_v2  ;;  %v1434_v23 = vpop.f32.mrb[5].mxu1 }
 0x326   :  { %v1435_v58 = vadd.f32 %v1434_v23, %v3129_v6  ;;  %v1436_v16 = vpop.f32.mrb[6].mxu1  ;;  %1607 = vmatpush1.bf16.msra.mxu1 %v2871_v14 }
 0x327   :  { %2261 = vtanh.f32 %v1433_v34  ;;  %v1437_v11 = vpop.f32.mrb[7].mxu1  ;;  %1608 = vmatprep.subr.bf16.mxu1 %v2874_v19 }
 0x328   :  { %2263 = vtanh.f32 %v1435_v58 }
 0x32a   :  { %1609 = vmatpush1.bf16.msra.mxu1 %v2877_v28 }
 0x32b   :  { %1610 = vmatprep.subr.bf16.mxu1 %v2880_v22 }
 0x32e   :  { %1611 = vmatpush1.bf16.msra.mxu1 %v2883_v10  ;;  %v3398_v10 = vld [vmem:[#allocation66_spill] sm:$0xff] }
 0x331   :  { %v2262_v26 = vpop.eup %2261  ;;  %1629 = vmatmul.mubr.bf16.vlgmr.msra.gmra.mrb[8].mxu1 %v1472_v18 }
 0x332   :  { %v2264_v25 = vpop.eup %2263 }
 0x333   :  { %v1448_v12 = vcombine.low %v2262_v26, %v2264_v25 }
 0x335   :  { %1452 = vst [vmem:[#allocation10 + $0x8] sm:$0xff] %v1448_v12 }
 0x404   :  { %v1630_v24 = vpop.f32.mrb[8].mxu1 }
 0x405   :  { %v1946_v14 = vadd.f32 %v1630_v24, %v2920_v17  ;;  %v1632_v21 = vpop.f32.mrb[9].mxu1  ;;  %v3399_v17 = vld [vmem:[#allocation67_spill] sm:$0xff] }
 0x406   :  { %v1947_v19 = vadd.f32 %v1632_v21, %v2924_v20  ;;  %v1634_v15 = vpop.f32.mrb[10].mxu1  ;;  %v3400_v20 = vld [vmem:[#allocation68_spill] sm:$0xff] }
 0x407   :  { %2265 = vtanh.f32 %v1946_v14  ;;  %v1635_v28 = vpop.f32.mrb[11].mxu1 }
 0x408   :  { %2267 = vtanh.f32 %v1947_v19 }
 0x411   :  { %v2266_v38 = vpop.eup %2265 }
 0x412   :  { %v2268_v22 = vpop.eup %2267  ;;  %v1639_v30 = vpack.c.bf16 %v2266_v38, %v2266_v38 }
 0x413   :  { %v1640_v29 = vpack.c.bf16 %v2268_v22, %v2268_v22 }
 0x415   :  { %1673 = vmatprep.mubr.bf16.mxu0 %v1640_v29 }
 0x416   :  { %1674 = vmatmul.mubr.bf16.vlgmr.msra.gmra.mrb[4].mxu0 %v1639_v30 }
 0x417   :  { %1683 = vmatpush1.bf16.msra.mxu0 %v2928_v36  ;;  %1714 = vmatprep.mubr.bf16.mxu0 %v1640_v29  ;;  %v3401_v36 = vld [vmem:[#allocation69_spill] sm:$0xff] }
 0x418   :  { %1684 = vmatprep.subr.bf16.mxu0 %v2932_v59  ;;  %v3402_v59 = vld [vmem:[#allocation70_spill] sm:$0xff] }
 0x41b   :  { %1685 = vmatpush1.bf16.msra.mxu0 %v2936_v60  ;;  %v3403_v60 = vld [vmem:[#allocation71_spill] sm:$0xff] }
 0x41c   :  { %1686 = vmatprep.subr.bf16.mxu0 %v2939_v63  ;;  %v3404_v63 = vld [vmem:[#allocation72_spill] sm:$0xff] }
 0x41f   :  { %1687 = vmatpush1.bf16.msra.mxu0 %v2942_v0  ;;  %v3405_v0 = vld [vmem:[#allocation73_spill] sm:$0xff] }
 0x420   :  { %1688 = vmatprep.subr.bf16.mxu0 %v2945_v3  ;;  %v3406_v3 = vld [vmem:[#allocation74_spill] sm:$0xff] }
 0x423   :  { %1689 = vmatpush1.bf16.msra.mxu0 %v2948_v4  ;;  %v3407_v4 = vld [vmem:[#allocation75_spill] sm:$0xff] }
 0x424   :  { %1690 = vmatprep.subr.bf16.mxu0 %v2951_v7  ;;  %v3408_v7 = vld [vmem:[#allocation76_spill] sm:$0xff] }
 0x427   :  { %1691 = vmatpush1.bf16.msra.mxu0 %v2954_v8  ;;  %v3409_v8 = vld [vmem:[#allocation77_spill] sm:$0xff] }
 0x428   :  { %1692 = vmatprep.subr.bf16.mxu0 %v2957_v9  ;;  %v3410_v9 = vld [vmem:[#allocation78_spill] sm:$0xff] }
 0x42b   :  { %1693 = vmatpush1.bf16.msra.mxu0 %v3398_v10 }
 0x42c   :  { %1694 = vmatprep.subr.bf16.mxu0 %v3399_v17 }
 0x42f   :  { %1695 = vmatpush1.bf16.msra.mxu0 %v3400_v20 }
 0x430   :  { %1696 = vmatprep.subr.bf16.mxu0 %v3401_v36 }
 0x433   :  { %1697 = vmatpush1.bf16.msra.mxu0 %v3402_v59 }
 0x434   :  { %1698 = vmatprep.subr.bf16.mxu0 %v3403_v60 }
 0x437   :  { %1699 = vmatpush1.bf16.msra.mxu0 %v3404_v63 }
 0x438   :  { %1700 = vmatprep.subr.bf16.mxu0 %v3405_v0 }
 0x43b   :  { %1701 = vmatpush1.bf16.msra.mxu0 %v3406_v3 }
 0x43c   :  { %1702 = vmatprep.subr.bf16.mxu0 %v3407_v4 }
 0x43f   :  { %1703 = vmatpush1.bf16.msra.mxu0 %v3408_v7 }
 0x440   :  { %1704 = vmatprep.subr.bf16.mxu0 %v3409_v8 }
 0x443   :  { %1705 = vmatpush1.bf16.msra.mxu0 %v3410_v9 }
 0x444   :  { %1706 = vmatprep.subr.bf16.mxu0 %v3411_v31 }
 0x447   :  { %1707 = vmatpush1.bf16.msra.mxu0 %v3412_v32 }
 0x448   :  { %1708 = vmatprep.subr.bf16.mxu0 %v3413_v35 }
 0x44b   :  { %1709 = vmatpush1.bf16.msra.mxu0 %v3414_v37 }
 0x44c   :  { %1710 = vmatprep.subr.bf16.mxu0 %v3415_v39 }
 0x44f   :  { %1711 = vmatpush1.bf16.msra.mxu0 %v3416_v41 }
 0x450   :  { %1712 = vmatprep.subr.bf16.mxu0 %v3417_v42 }
 0x453   :  { %1713 = vmatpush1.bf16.msra.mxu0 %v3022_v40 }
 0x456   :  { %1715 = vmatmul.mubr.bf16.vlgmr.msra.gmra.mrb[8].mxu0 %v1639_v30 }
 0x457   :  { %2402 = shalt.err (!%p2399_p8)
}
 0x458   :  { %s2403_s10 = scalar_lea.hbm %s3206_s6, 256 }
 0x459   :  { %p2404_p9 = scmp.ne.s32.totalorder %s3206_s6, %s2403_s10  ;;  %p2407_p10 = scmp.lt.u32.totalorder %s2403_s10, %s3206_s6 }
 0x45b   :  { %p2409_p11 = pnand %p2407_p10, %p2404_p9 }
 0x45d   :  { %2412 = shalt.err (!%p2409_p11)
}
 0x45e   :  { %1746 = dma.vmem_to_hbm [thread:$0]  %s1744_s29, 256, %s3206_s6, [#allocation4]  }
 0x45f   :  { %s2455_s6 = smov [#allocation11]  }
 0x460   :  { %s1753_s15 = sshll.u32 %s2455_s6, 4  ;;  %s1754_s15 = int_to_ptr.vmem [resolvable:$true] %s1753_s15 }
 0x461   :  { %s2413_s16 = scalar_lea.vmem %s1754_s15, 256  ;;  %p2418_p13 = scmp.lt.s32.totalorder %s1754_s15, %s1754_s15 }
 0x462   :  { %p2414_p12 = scmp.ne.s32.totalorder %s1754_s15, %s2413_s16  ;;  %p2419_p0 = scmp.lt.s32.totalorder %s2413_s16, %s2413_s16 }
 0x464   :  { %p2420_p1 = por %p2419_p0, %p2418_p13 }
 0x466   :  { %p2421_p2 = pnand %p2420_p1, %p2414_p12 }
 0x4e9   :  { %v1675_v40 = vpop.f32.mrb[4].mxu0 }
 0x4ea   :  { %v1676_v43 = vadd.f32 %v1675_v40, %v3083_v55  ;;  %v1677_v44 = vpop.f32.mrb[5].mxu0 }
 0x4eb   :  { %v1678_v45 = vadd.f32 %v1677_v44, %v3088_v61  ;;  %v1679_v46 = vpop.f32.mrb[6].mxu0 }
 0x4ec   :  { %2269 = vtanh.f32 %v1676_v43  ;;  %v1680_v47 = vpop.f32.mrb[7].mxu0 }
 0x4ed   :  { %2271 = vtanh.f32 %v1678_v45 }
 0x4f6   :  { %v2270_v48 = vpop.eup %2269 }
 0x4f7   :  { %v2272_v49 = vpop.eup %2271 }
 0x4f8   :  { %v1731_v50 = vcombine.low %v2270_v48, %v2272_v49 }
 0x4fa   :  { %1735 = vst [vmem:[#allocation11] sm:$0xff] %v1731_v50 }
 0x529   :  { %v1716_v51 = vpop.f32.mrb[8].mxu0 }
 0x52a   :  { %v1717_v53 = vadd.f32 %v1716_v51, %v3126_v2  ;;  %v1718_v54 = vpop.f32.mrb[9].mxu0 }
 0x52b   :  { %v1719_v56 = vadd.f32 %v1718_v54, %v3129_v6  ;;  %v1720_v57 = vpop.f32.mrb[10].mxu0 }
 0x52c   :  { %2273 = vtanh.f32 %v1717_v53  ;;  %v1721_v55 = vpop.f32.mrb[11].mxu0 }
 0x52d   :  { %2275 = vtanh.f32 %v1719_v56 }
 0x536   :  { %v2274_v61 = vpop.eup %2273 }
 0x537   :  { %v2276_v33 = vpop.eup %2275 }
 0x538   :  { %v1732_v13 = vcombine.low %v2274_v61, %v2276_v33 }
 0x53a   :  { %1736 = vst [vmem:[#allocation11 + $0x8] sm:$0xff] %v1732_v13 }
 0x53b   :  { %2424 = shalt.err (!%p2421_p2)
}
 0x53c   :  { %s2425_s19 = scalar_lea.hbm %s3207_s7, 256 }
 0x53d   :  { %p2426_p3 = scmp.ne.s32.totalorder %s3207_s7, %s2425_s19  ;;  %p2429_p4 = scmp.lt.u32.totalorder %s2425_s19, %s3207_s7 }
 0x53f   :  { %p2431_p5 = pnand %p2429_p4, %p2426_p3 }
 0x541   :  { %2434 = shalt.err (!%p2431_p5)
}
 0x542   :  { %1756 = dma.vmem_to_hbm [thread:$0]  %s1754_s15, 256, %s3207_s7, [#allocation12]  }
 0x543   :  { %2441 = dma.done.wait [#allocation4], 256  }
 0x544   :  { %2442 = vsyncadd [#allocation4], 4294967040 }
 0x545   :  { %2443 = dma.done.wait [#allocation12], 256  }
 0x546   :  { %2444 = vsyncadd [#allocation12], 4294967040 }
 0x547   :  { %1763 = vsyncpa [#allocation3], 1 }
 0x548   :  { %1764 = vsyncpa [#allocation6], 1 }
 0x549   :  { %1765 = vsyncpa [#allocation9], 1 }
 0x54a   :  { %1766 = vsyncpa [#allocation4], 1 }
 0x54b   :  { %1767 = vsyncpa [#allocation12], 1 }

</bundles_post_ra>
